<compile_context>
chip_gen: v7x
topology: tpu7x:2x2x1
jax: 0.10.0
libtpu: 0.0.40
codegen_flags: <defaults>
</compile_context>

<pallas_src>
import functools

import jax
import jax.numpy as jnp
from jax.experimental import pallas as pl
from jax.experimental.pallas import tpu as pltpu

N_BINS = 41      # logical feature width (PyTorch module)
N_PAD = 128      # lane-padded hidden / padded-output width
CHUNK = 512      # inner compute-chunk rows (multiple of 8)


def _round_up(x, m):
    return ((x + m - 1) // m) * m


def _leaky_relu(x, slope=0.2):
    # max(x, 0.2*x) == LeakyReLU(0.2) for slope in (0, 1); saves a cmp+select.
    return jnp.maximum(x, slope * x)


def cos_mlp_kernel(x_ref, w1_ref, b1_ref, w2_ref, b2_ref, w3_ref, b3_ref, o_ref,
                   *, chunk):
    """Fused (Linear -> LeakyReLU) x2 -> Linear on one (TILE_B, 41) batch tile.

    Shapes inside the kernel:
      x:  (tb, 41)  f32
      w1: (41, 128)  bf16   b1: (1, 128) f32
      w2: (128, 128) bf16   b2: (1, 128) f32
      w3: (128, 128) bf16   b3: (1, 128) f32  (cols >= 41 are zero, never stored)
      out:(tb, 41)  f32
    Compute runs in `chunk`-row sub-blocks so intermediates stay small even for
    very large DMA tiles.
    """
    n_chunks = x_ref.shape[0] // chunk

    # Hoist weight/bias loads out of the chunk loop (VMEM-resident values).
    w1 = w1_ref[...]
    w2 = w2_ref[...]
    w3 = w3_ref[...]
    b1 = b1_ref[...]
    b2 = b2_ref[...]
    b3 = b3_ref[...]

    @pl.loop(0, n_chunks)
    def _(c):
        r = pl.multiple_of(c * chunk, chunk)

        x = x_ref[pl.ds(r, chunk), :].astype(jnp.bfloat16)            # (chunk, 41)

        h1 = jnp.dot(x, w1, preferred_element_type=jnp.float32) + b1   # (chunk, 128)
        h1 = _leaky_relu(h1)

        h2 = jnp.dot(h1.astype(jnp.bfloat16), w2,
                     preferred_element_type=jnp.float32) + b2           # (chunk, 128)
        h2 = _leaky_relu(h2)

        h3 = jnp.dot(h2.astype(jnp.bfloat16), w3,
                     preferred_element_type=jnp.float32) + b3           # (chunk, 128)

        o_ref[pl.ds(r, chunk), :] = h3[:, :N_BINS].astype(o_ref.dtype)


def prepare_params(params):
    """One-time preprocessing (keep OUT of the hot path).

    Transposes PyTorch-style (out, in) weights to (in, out), zero-pads feature
    axes to 128 lanes, and stores weights in bf16 (biases stay f32; bias add and
    activations run in f32 inside the kernel). Zero padding is numerically exact
    for this network (padded lanes stay 0 through bias + LeakyReLU and are never
    stored).
    """
    def pad2(a, shape, dtype):
        z = jnp.zeros(shape, dtype)
        return z.at[: a.shape[0], : a.shape[1]].set(a.astype(dtype))

    return {
        "w1": pad2(params["w1"].T, (N_BINS, N_PAD), jnp.bfloat16),        # (41, 128)
        "b1": pad2(params["b1"].reshape(1, -1), (1, N_PAD), jnp.float32),  # (1, 128)
        "w2": pad2(params["w2"].T, (N_PAD, N_PAD), jnp.bfloat16),          # (128, 128)
        "b2": pad2(params["b2"].reshape(1, -1), (1, N_PAD), jnp.float32),  # (1, 128)
        "w3": pad2(params["w3"].T, (N_PAD, N_PAD), jnp.bfloat16),          # (128, 128)
        "b3": pad2(params["b3"].reshape(1, -1), (1, N_PAD), jnp.float32),  # (1, 128)
    }


@functools.partial(jax.jit, static_argnames=("tile_b",))
def cos_mlp(x, prep, *, tile_b=8192):
    """x: (B, 41) float32. prep: output of prepare_params()."""
    B, F = x.shape
    assert F == N_BINS

    # Tile size: big (amortizes ~0.35us/step grid overhead), rounded to a
    # multiple of CHUNK, clamped to the batch. VMEM footprint at tb=8192:
    # ~8 MiB in + ~8 MiB out (double-buffered, lane-padded to 128) + resident
    # bf16 weights + <1 MiB chunk intermediates ~= 18 MiB.
    tile_b = _round_up(max(tile_b, CHUNK), CHUNK)
    tb = min(tile_b, _round_up(B, CHUNK))
    chunk = min(CHUNK, tb)
    grid = (pl.cdiv(B, tb),)

    tile_spec = pl.BlockSpec((tb, N_BINS), lambda i: (i, 0))        # x / out tiles
    resident = lambda shape: pl.BlockSpec(shape, lambda i: (0, 0))  # weights stay put

    weight_bytes = 2 * (N_BINS * N_PAD + 2 * N_PAD * N_PAD) + 4 * 3 * N_PAD
    cost = pl.CostEstimate(
        flops=2 * B * (N_BINS * N_PAD + 2 * N_PAD * N_PAD),
        transcendentals=0,
        bytes_accessed=2 * B * N_BINS * 4 + weight_bytes,
    )

    return pl.pallas_call(
        functools.partial(cos_mlp_kernel, chunk=chunk),
        out_shape=jax.ShapeDtypeStruct((B, N_BINS), x.dtype),
        grid_spec=pltpu.PrefetchScalarGridSpec(
            num_scalar_prefetch=0,
            grid=grid,
            in_specs=[
                tile_spec,                      # x       (tb, 41)
                resident((N_BINS, N_PAD)),      # w1      (41, 128)  bf16
                resident((1, N_PAD)),           # b1      (1, 128)   f32
                resident((N_PAD, N_PAD)),       # w2      (128, 128) bf16
                resident((1, N_PAD)),           # b2      (1, 128)   f32
                resident((N_PAD, N_PAD)),       # w3      (128, 128) bf16
                resident((1, N_PAD)),           # b3      (1, 128)   f32
            ],
            out_specs=tile_spec,                # out     (tb, 41)
        ),
        compiler_params=pltpu.CompilerParams(
            # Batch tiles are independent; on v7x consider CORE_PARALLEL /
            # core_map if a profile shows one TensorCore idle.
            dimension_semantics=("parallel",),
            # Above v5e's 16 MiB default scoped limit, ~30% headroom below
            # v7x's 64 MiB physical VMEM.
            vmem_limit_bytes=40 * 1024 * 1024,
        ),
        cost_estimate=cost,
    )(x, prep["w1"], prep["b1"], prep["w2"], prep["b2"], prep["w3"], prep["b3"])


def init_params(key):
    """Deterministic synthetic parameters with PyTorch nn.Linear shapes."""
    ks = jax.random.split(key, 6)
    bound = 1.0 / jnp.sqrt(N_BINS)
    u = lambda k, shape: jax.random.uniform(
        k, shape, dtype=jnp.float32, minval=-bound, maxval=bound
    )
    return {
        "w1": u(ks[0], (N_BINS, N_BINS)), "b1": u(ks[1], (N_BINS,)),
        "w2": u(ks[2], (N_BINS, N_BINS)), "b2": u(ks[3], (N_BINS,)),
        "w3": u(ks[4], (N_BINS, N_BINS)), "b3": u(ks[5], (N_BINS,)),
    }


def reference(x, p):
    """Pure-JAX f32 reference matching PyTorch eval-mode forward."""
    h = x @ p["w1"].T + p["b1"]
    h = jnp.where(h > 0, h, 0.2 * h)
    h = h @ p["w2"].T + p["b2"]
    h = jnp.where(h > 0, h, 0.2 * h)
    return h @ p["w3"].T + p["b3"]


if __name__ == "__main__":
    key = jax.random.PRNGKey(0)
    kx, kp = jax.random.split(key)

    # Small but multi-tile batch: with tile_b=512 this is 2 full 512-row tiles
    # plus a 176-row remainder, exercising the pipelined grid, the inner chunk
    # loop, and the masked partial last tile.
    batch = 1200
    x = jax.random.normal(kx, (batch, N_BINS), dtype=jnp.float32)
    params = init_params(kp)
    prep = prepare_params(params)          # one-time, outside the hot path

    out = cos_mlp(x, prep, tile_b=512)
    out = jax.block_until_ready(out)

    ref = reference(x, params)
    assert out.shape == (batch, N_BINS)
    # bf16 matmul operands with f32 accumulation -> ~1e-3..1e-2 abs/rel error.
    assert jnp.allclose(out, ref, atol=3e-2, rtol=3e-2), float(
        jnp.max(jnp.abs(out - ref))
    )

    print("KERNEL_OK")
</pallas_src>

<mosaic_0001>
module attributes {stable_mosaic.version = 11 : i64} {
  func.func @cos_mlp_kernel(%arg0: i32, %arg1: memref<512x41xf32, #tpu.memory_space<vmem>>, %arg2: memref<41x128xbf16, #tpu.memory_space<vmem>>, %arg3: memref<1x128xf32, #tpu.memory_space<vmem>>, %arg4: memref<128x128xbf16, #tpu.memory_space<vmem>>, %arg5: memref<1x128xf32, #tpu.memory_space<vmem>>, %arg6: memref<128x128xbf16, #tpu.memory_space<vmem>>, %arg7: memref<1x128xf32, #tpu.memory_space<vmem>>, %arg8: memref<512x41xf32, #tpu.memory_space<vmem>>) attributes {dimension_semantics = [#tpu.dimension_semantics<parallel>], iteration_bounds = array<i64: 3>, scalar_prefetch = 0 : i64, scratch_operands = 0 : i64, tpu.core_type = #tpu.core_type<tc>, window_params = [{transform_indices = @transform_0, window_bounds = array<i64: 512, 41>}, {pipeline_mode = #tpu.pipeline_mode<synchronous>, transform_indices = @transform_1, window_bounds = array<i64: 41, 128>}, {pipeline_mode = #tpu.pipeline_mode<synchronous>, transform_indices = @transform_2, window_bounds = array<i64: 1, 128>}, {pipeline_mode = #tpu.pipeline_mode<synchronous>, transform_indices = @transform_3, window_bounds = array<i64: 128, 128>}, {pipeline_mode = #tpu.pipeline_mode<synchronous>, transform_indices = @transform_4, window_bounds = array<i64: 1, 128>}, {pipeline_mode = #tpu.pipeline_mode<synchronous>, transform_indices = @transform_5, window_bounds = array<i64: 128, 128>}, {pipeline_mode = #tpu.pipeline_mode<synchronous>, transform_indices = @transform_6, window_bounds = array<i64: 1, 128>}, {transform_indices = @transform_7, window_bounds = array<i64: 512, 41>}]} {
    %c0 = arith.constant 0 : index
    %c0_0 = arith.constant 0 : index
    %0 = vector.load %arg2[%c0, %c0_0] : memref<41x128xbf16, #tpu.memory_space<vmem>>, vector<41x128xbf16>
    %c0_1 = arith.constant 0 : index
    %c0_2 = arith.constant 0 : index
    %1 = vector.load %arg4[%c0_1, %c0_2] : memref<128x128xbf16, #tpu.memory_space<vmem>>, vector<128x128xbf16>
    %c0_3 = arith.constant 0 : index
    %c0_4 = arith.constant 0 : index
    %2 = vector.load %arg6[%c0_3, %c0_4] : memref<128x128xbf16, #tpu.memory_space<vmem>>, vector<128x128xbf16>
    %c0_5 = arith.constant 0 : index
    %c0_6 = arith.constant 0 : index
    %3 = vector.load %arg3[%c0_5, %c0_6] : memref<1x128xf32, #tpu.memory_space<vmem>>, vector<1x128xf32>
    %c0_7 = arith.constant 0 : index
    %c0_8 = arith.constant 0 : index
    %4 = vector.load %arg5[%c0_7, %c0_8] : memref<1x128xf32, #tpu.memory_space<vmem>>, vector<1x128xf32>
    %c0_9 = arith.constant 0 : index
    %c0_10 = arith.constant 0 : index
    %5 = vector.load %arg7[%c0_9, %c0_10] : memref<1x128xf32, #tpu.memory_space<vmem>>, vector<1x128xf32>
    %c0_i32 = arith.constant 0 : i32
    %c1_i32 = arith.constant 1 : i32
    %6 = arith.muli %c0_i32, %c1_i32 : i32
    %c0_i32_11 = arith.constant 0 : i32
    %7 = arith.addi %c0_i32_11, %6 : i32
    %c512_i32 = arith.constant 512 : i32
    %8 = arith.muli %7, %c512_i32 : i32
    %9 = tpu.assume_multiple %8, 512 : i32
    %10 = arith.index_cast %9 : i32 to index
    %c0_12 = arith.constant 0 : index
    %11 = vector.load %arg1[%10, %c0_12] : memref<512x41xf32, #tpu.memory_space<vmem>>, vector<512x41xf32>
    %12 = arith.truncf %11 : vector<512x41xf32> to vector<512x41xbf16>
    %cst = arith.constant dense<0.000000e+00> : vector<512x128xf32>
    %13 = tpu.matmul %12, %0, %cst {dimension_numbers = #tpu.dot_dimension_numbers<[1], [0], [0], [1], [0, 0, 1, 1], [], []>} : vector<512x41xbf16>, vector<41x128xbf16>, vector<512x128xf32> -> vector<512x128xf32>
    %14 = vector.broadcast %3 : vector<1x128xf32> to vector<512x128xf32>
    %15 = arith.addf %13, %14 : vector<512x128xf32>
    %cst_13 = arith.constant 2.000000e-01 : f32
    %16 = vector.broadcast %cst_13 : f32 to vector<512x128xf32>
    %17 = arith.mulf %16, %15 : vector<512x128xf32>
    %18 = arith.maximumf %15, %17 : vector<512x128xf32>
    %19 = arith.truncf %18 : vector<512x128xf32> to vector<512x128xbf16>
    %cst_14 = arith.constant dense<0.000000e+00> : vector<512x128xf32>
    %20 = tpu.matmul %19, %1, %cst_14 {dimension_numbers = #tpu.dot_dimension_numbers<[1], [0], [0], [1], [0, 0, 1, 1], [], []>} : vector<512x128xbf16>, vector<128x128xbf16>, vector<512x128xf32> -> vector<512x128xf32>
    %21 = vector.broadcast %4 : vector<1x128xf32> to vector<512x128xf32>
    %22 = arith.addf %20, %21 : vector<512x128xf32>
    %cst_15 = arith.constant 2.000000e-01 : f32
    %23 = vector.broadcast %cst_15 : f32 to vector<512x128xf32>
    %24 = arith.mulf %23, %22 : vector<512x128xf32>
    %25 = arith.maximumf %22, %24 : vector<512x128xf32>
    %26 = arith.truncf %25 : vector<512x128xf32> to vector<512x128xbf16>
    %cst_16 = arith.constant dense<0.000000e+00> : vector<512x128xf32>
    %27 = tpu.matmul %26, %2, %cst_16 {dimension_numbers = #tpu.dot_dimension_numbers<[1], [0], [0], [1], [0, 0, 1, 1], [], []>} : vector<512x128xbf16>, vector<128x128xbf16>, vector<512x128xf32> -> vector<512x128xf32>
    %28 = vector.broadcast %5 : vector<1x128xf32> to vector<512x128xf32>
    %29 = arith.addf %27, %28 : vector<512x128xf32>
    %30 = vector.extract_strided_slice %29 {offsets = [0, 0], sizes = [512, 41], strides = [1, 1]} : vector<512x128xf32> to vector<512x41xf32>
    %31 = arith.index_cast %9 : i32 to index
    %c0_17 = arith.constant 0 : index
    %32 = vector.load %arg8[%31, %c0_17] : memref<512x41xf32, #tpu.memory_space<vmem>>, vector<512x41xf32>
    tpu.vector_store %arg8[%31, %c0_17], %30 {strides = array<i32>} : memref<512x41xf32, #tpu.memory_space<vmem>>, vector<512x41xf32>,
    %c1_i32_18 = arith.constant 1 : i32
    return
  }
  func.func @transform_0(%arg0: i32) -> (i32, i32) {
    %c0_i32 = arith.constant 0 : i32
    %c0_i32_0 = arith.constant 0 : i32
    return %arg0, %c0_i32 : i32, i32
  }
  func.func @transform_1(%arg0: i32) -> (i32, i32) {
    %c0_i32 = arith.constant 0 : i32
    %c0_i32_0 = arith.constant 0 : i32
    %c0_i32_1 = arith.constant 0 : i32
    return %c0_i32, %c0_i32_0 : i32, i32
  }
  func.func @transform_2(%arg0: i32) -> (i32, i32) {
    %c0_i32 = arith.constant 0 : i32
    %c0_i32_0 = arith.constant 0 : i32
    %c0_i32_1 = arith.constant 0 : i32
    return %c0_i32, %c0_i32_0 : i32, i32
  }
  func.func @transform_3(%arg0: i32) -> (i32, i32) {
    %c0_i32 = arith.constant 0 : i32
    %c0_i32_0 = arith.constant 0 : i32
    %c0_i32_1 = arith.constant 0 : i32
    return %c0_i32, %c0_i32_0 : i32, i32
  }
  func.func @transform_4(%arg0: i32) -> (i32, i32) {
    %c0_i32 = arith.constant 0 : i32
    %c0_i32_0 = arith.constant 0 : i32
    %c0_i32_1 = arith.constant 0 : i32
    return %c0_i32, %c0_i32_0 : i32, i32
  }
  func.func @transform_5(%arg0: i32) -> (i32, i32) {
    %c0_i32 = arith.constant 0 : i32
    %c0_i32_0 = arith.constant 0 : i32
    %c0_i32_1 = arith.constant 0 : i32
    return %c0_i32, %c0_i32_0 : i32, i32
  }
  func.func @transform_6(%arg0: i32) -> (i32, i32) {
    %c0_i32 = arith.constant 0 : i32
    %c0_i32_0 = arith.constant 0 : i32
    %c0_i32_1 = arith.constant 0 : i32
    return %c0_i32, %c0_i32_0 : i32, i32
  }
  func.func @transform_7(%arg0: i32) -> (i32, i32) {
    %c0_i32 = arith.constant 0 : i32
    %c0_i32_0 = arith.constant 0 : i32
    return %arg0, %c0_i32 : i32, i32
  }
}

</mosaic_0001>

<bundles_post_ra>
// kernel: cos_mlp.1
= control target key start
LH: loop header
LB: loop body
LE: loop exit
PB: predicated region body
PF: predicated region fallthrough
CT: control target
= control target key end

     0   :  { %s3060_s24 = smov 0   ;;  %s3062_s25 = smov 0   ;;  %s3826_s0 = inlined_call_operand.vmem [shape: f32[1200,41], index: 0, kind: input, shape index: {}]   ;;  %s3827_s1 = inlined_call_operand.vmem [shape: bf16[41,128], index: 1, kind: input, shape index: {}]   ;;  %s3828_s2 = inlined_call_operand.vmem [shape: f32[1,128], index: 2, kind: input, shape index: {}]   ;;  %s3829_s3 = inlined_call_operand.vmem [shape: bf16[128,128], index: 3, kind: input, shape index: {}]   ;;  %s3830_s4 = inlined_call_operand.vmem [shape: f32[1,128], index: 4, kind: input, shape index: {}]   ;;  %s3831_s5 = inlined_call_operand.vmem [shape: bf16[128,128], index: 5, kind: input, shape index: {}]   ;;  %s3832_s6 = inlined_call_operand.vmem [shape: f32[1,128], index: 6, kind: input, shape index: {}]   ;;  %s3833_s7 = inlined_call_operand.vmem [shape: f32[1200,41], index: 7, kind: output, shape index: {}]  }
   0x1   :  { %s3064_s26 = smov 0  }
   0x2 LB: > { %s3073_s27 = sadd.s32 4294967295, %s2985_s26   ;;  %s3075_s28 = sadd.s32 1, %s2985_s26   ;;  %s2985_s26 = sphi %s3064_s26, %s3842_s26   ;;  %s2981_s25 = sphi %s3062_s25, %s3841_s25   ;;  %s2977_s24 = sphi %s3060_s24, %s3840_s24  }
   0x3   : > { %s173_s29 = ssub.s32 %s2985_s26, %s3075_s28  ;;  %s176_s30 = sadd.s32 1, %s2981_s25 }
   0x4   : > { %p174_p0 = scmp.eq.s32.totalorder %s173_s29, 0  ;;  %p186_p1 = scmp.ne.s32.totalorder %s2981_s25, %s2977_s24 }
   0x5   : > { %p187_p2 = scmp.eq.s32.totalorder %s3073_s27, 2  ;;  %p2394_p3 = scmp.ge.s32.totalorder %s2985_s26, 1 }
   0x6   : > { %s3083_s8 = scalar_select %p174_p0, %s2981_s25, %s176_s30  }
   0x7   : > { %p3085_p4 = por %p187_p2, %p186_p1  ;;  %p246_p5 = scmp.lt.s32.totalorder %s2985_s26, 4 }
   0x9   : > { %p247_p6 = pnand %p2394_p3, %p246_p5 }
   0xa   : > { %v2912_v0 = vld [vmem:[%s3827_s1] sm:$0xff] (!%p247_p6)   ;;  %vm558_vm0 = vcmask (!%p247_p6), 1043456   ;;  %v2913_v1 = vld [vmem:[%s3827_s1 + $0x8] sm:$0xff] (!%p247_p6)   ;;  %vm559_vm1 = vcmask (!%p247_p6), 1044480   ;;  %v2914_v2 = vld [vmem:[%s3827_s1 + $0x10] sm:$0x1f] (!%p247_p6)  }
   0xb   : > { %250 = sbr.rel (%p247_p6) target bundleno = 884 (0x374), region = 48  ;;  %2587 = vmatprep.subr.bf16.mxu0 (!%p247_p6), %v2912_v0  ;;  %2817 = vmatprep.subr.bf16.mxu1 (!%p247_p6), %v2912_v0  ;;  %s3099_s16 = sshll.u32 (!%p247_p6), %s3073_s27, 6  ;;  %v3019_v3 = vmov (!%p247_p6), 65535   ;;  %v2915_v7 = vld [vmem:[%s3829_s3] sm:$0xff] (!%p247_p6)   ;;  %vm461_vm2 = vcmask (!%p247_p6), 334848   ;;  %v2916_v34 = vld [vmem:[%s3829_s3 + $0x8] sm:$0xff] (!%p247_p6)  }
   0xc   : > { %2588 = vmatpush3.bf16.msra.mxu0 (!%p247_p6), %v2912_v0  ;;  %2820 = vmatpush3.bf16.msra.mxu1 (!%p247_p6), %v2912_v0  ;;  %v560_v4 = vsel (!%p247_p6), %vm558_vm0, 4294967295, %v3019_v3  ;;  %p286_p7 = scmp.lt.s32.totalorder (!%p247_p6), %s3099_s16, 149  ;;  %v2917_v43 = vld [vmem:[%s3829_s3 + $0x10] sm:$0xff] (!%p247_p6)   ;;  %v2918_v48 = vld [vmem:[%s3829_s3 + $0x18] sm:$0xff] (!%p247_p6)   ;;  %v2919_v55 = vld [vmem:[%s3829_s3 + $0x20] sm:$0xff] (!%p247_p6)   ;;  %s278_s30 = sand.u32 (!%p247_p6), 1, %s2977_s24  }
   0xd   : > { %2589 = vmatprep.subr.bf16.mxu0 (!%p247_p6), %v2913_v1  ;;  %2818 = vmatprep.subr.bf16.mxu1 (!%p247_p6), %v2913_v1  ;;  %v561_v5 = vsel (!%p247_p6), %vm559_vm1, %v560_v4, 0  ;;  %v2920_v62 = vld [vmem:[%s3829_s3 + $0x28] sm:$0xff] (!%p247_p6)   ;;  %s2395_s10 = sshll.u32 (!%p247_p6), %s278_s30, 9 }
   0xe   : > { %v563_v6 = vand.u32 (!%p247_p6), %v2914_v2, %v561_v5  ;;  %s3428_s13 = scalar_lea.vmem (!%p247_p6), [#allocation2], %s2395_s10  }
  0x10   : > { %2590 = vmatpush3.bf16.msra.mxu0 (!%p247_p6), %v2913_v1  ;;  %2821 = vmatpush3.bf16.msra.mxu1 (!%p247_p6), %v2913_v1 }
  0x11   : > { %2591 = vmatprep.subr.bf16.mxu0 (!%p247_p6), %v563_v6  ;;  %2819 = vmatprep.subr.bf16.mxu1 (!%p247_p6), %v563_v6 }
  0x12   : > { %s287_s17 = scalar_select %p286_p7, %s3099_s16, 149 }
  0x13   : > { %s1932_s24 = ssub.s32 (%p3085_p4), 150, %s3099_s16  ;;  %s2469_s14 = sshll.u32 (%p3085_p4), %s3073_s27, 9 }
  0x14   : > { %s2397_s18 = sshll.u32 %s287_s17, 3  ;;  %2592 = vmatpush3.bf16.msra.mxu0 %v563_v6  ;;  %2822 = vmatpush3.bf16.msra.mxu1 %v563_v6  ;;  %p1933_p8 = scmp.lt.s32.totalorder (%p3085_p4), %s1932_s24, 64 }
  0x15   : > { %s3109_s23 = scalar_lea.vmem %s3826_s0, %s2397_s18  ;;  %2657 = vmatprep.subr.bf16.mxu1 %v2915_v7  ;;  %s3627_s18 = scalar_lea.vmem (%p3085_p4), %s3833_s7, %s2469_s14  }
  0x16   : > { %v342_v8 = vld [vmem:[%s3109_s23] sm:$0xff]  ;;  %v343_v9 = vld [vmem:[%s3109_s23 + $0x8] sm:$0xff]  ;;  %v344_v10 = vld [vmem:[%s3109_s23 + $0x10] sm:$0xff] }
  0x17   : > { %v406_v11 = vpack.c.bf16 %v343_v9, %v342_v8  ;;  %v345_v12 = vld [vmem:[%s3109_s23 + $0x18] sm:$0xff]  ;;  %v346_v13 = vld [vmem:[%s3109_s23 + $0x20] sm:$0xff]  ;;  %v347_v14 = vld [vmem:[%s3109_s23 + $0x28] sm:$0xff] }
  0x18   : > { %v407_v15 = vpack.c.bf16 %v345_v12, %v344_v10  ;;  %v408_v16 = vpack.c.bf16 %v347_v14, %v346_v13  ;;  %v348_v17 = vld [vmem:[%s3109_s23 + $0x30] sm:$0xff]  ;;  %v349_v18 = vld [vmem:[%s3109_s23 + $0x38] sm:$0xff]  ;;  %v350_v19 = vld [vmem:[%s3109_s23 + $0x40] sm:$0xff] }
  0x19   : > { %2593 = vmatprep.mubr.msk.bf16.mxu0 %vm461_vm2, %v406_v11  ;;  %v351_v20 = vld [vmem:[%s3109_s23 + $0x48] sm:$0xff]  ;;  %v409_v21 = vpack.c.bf16 %v349_v18, %v348_v17  ;;  %v374_v23 = vld [vmem:[%s3109_s23 + $0x100] sm:$0xff]  ;;  %v376_v25 = vld [vmem:[%s3109_s23 + $0x110] sm:$0xff] }
  0x1a   : > { %2594 = vmatmul.mubr.msk.bf16.vlgmr.msra.gmra.mrb[0].mxu0 %vm461_vm2, %v407_v15  ;;  %v410_v22 = vpack.c.bf16 %v351_v20, %v350_v19  ;;  %v375_v24 = vld [vmem:[%s3109_s23 + $0x108] sm:$0xff]  ;;  %v377_v26 = vld [vmem:[%s3109_s23 + $0x118] sm:$0xff]  ;;  %v378_v29 = vld [vmem:[%s3109_s23 + $0x120] sm:$0xff] }
  0x1b   : > { %2597 = vmatprep.mubr.msk.bf16.mxu0 %vm461_vm2, %v408_v16  ;;  %v422_v27 = vpack.c.bf16 %v375_v24, %v374_v23  ;;  %v423_v28 = vpack.c.bf16 %v377_v26, %v376_v25  ;;  %v379_v30 = vld [vmem:[%s3109_s23 + $0x128] sm:$0xff]  ;;  %v352_v31 = vld [vmem:[%s3109_s23 + $0x50] sm:$0xff]  ;;  %v353_v32 = vld [vmem:[%s3109_s23 + $0x58] sm:$0xff] }
  0x1c   : > { %v424_v33 = vpack.c.bf16 %v379_v30, %v378_v29  ;;  %v354_v35 = vld [vmem:[%s3109_s23 + $0x60] sm:$0xff]  ;;  %v355_v36 = vld [vmem:[%s3109_s23 + $0x68] sm:$0xff]  ;;  %v411_v37 = vpack.c.bf16 %v353_v32, %v352_v31  ;;  %v380_v38 = vld [vmem:[%s3109_s23 + $0x130] sm:$0xff] }
  0x1d   : > { %2625 = vmatprep.mubr.msk.bf16.mxu1 %vm461_vm2, %v422_v27  ;;  %v381_v39 = vld [vmem:[%s3109_s23 + $0x138] sm:$0xff]  ;;  %v412_v40 = vpack.c.bf16 %v355_v36, %v354_v35  ;;  %v382_v41 = vld [vmem:[%s3109_s23 + $0x140] sm:$0xff]  ;;  %v383_v42 = vld [vmem:[%s3109_s23 + $0x148] sm:$0xff] }
  0x1e   : > { %2626 = vmatmul.mubr.msk.bf16.vlgmr.msra.gmra.mrb[0].mxu1 %vm461_vm2, %v423_v28  ;;  %v425_v44 = vpack.c.bf16 %v381_v39, %v380_v38  ;;  %v356_v45 = vld [vmem:[%s3109_s23 + $0x70] sm:$0xff]  ;;  %v357_v46 = vld [vmem:[%s3109_s23 + $0x78] sm:$0xff]  ;;  %v426_v47 = vpack.c.bf16 %v383_v42, %v382_v41  ;;  %v358_v49 = vld [vmem:[%s3109_s23 + $0x80] sm:$0xff] }
  0x1f   : > { %2629 = vmatprep.mubr.msk.bf16.mxu1 %vm461_vm2, %v424_v33  ;;  %2658 = vmatpush3.bf16.msra.mxu1 %v2915_v7  ;;  %v359_v50 = vld [vmem:[%s3109_s23 + $0x88] sm:$0xff]  ;;  %v384_v51 = vld [vmem:[%s3109_s23 + $0x150] sm:$0xff]  ;;  %v385_v52 = vld [vmem:[%s3109_s23 + $0x158] sm:$0xff]  ;;  %v413_v56 = vpack.c.bf16 %v357_v46, %v356_v45 }
  0x20   : > { %2659 = vmatprep.subr.bf16.mxu1 %v2916_v34  ;;  %v386_v53 = vld [vmem:[%s3109_s23 + $0x160] sm:$0xff]  ;;  %v387_v54 = vld [vmem:[%s3109_s23 + $0x168] sm:$0xff]  ;;  %v414_v57 = vpack.c.bf16 %v359_v50, %v358_v49  ;;  %v427_v58 = vpack.c.bf16 %v385_v52, %v384_v51  ;;  %v360_v60 = vld [vmem:[%s3109_s23 + $0x90] sm:$0xff] }
  0x21   : > { %v428_v59 = vpack.c.bf16 %v387_v54, %v386_v53  ;;  %v361_v61 = vld [vmem:[%s3109_s23 + $0x98] sm:$0xff]  ;;  %v362_v63 = vld [vmem:[%s3109_s23 + $0xa0] sm:$0xff]  ;;  %v363_v0 = vld [vmem:[%s3109_s23 + $0xa8] sm:$0xff] }
  0x22   : > { %2598 = vmatmul.mubr.msk.bf16.gmra.mrb[4].mxu0 %vm461_vm2, %v409_v21  ;;  %v415_v1 = vpack.c.bf16 %v361_v61, %v360_v60  ;;  %v388_v2 = vld [vmem:[%s3109_s23 + $0x170] sm:$0xff]  ;;  %v389_v3 = vld [vmem:[%s3109_s23 + $0x178] sm:$0xff]  ;;  %v416_v4 = vpack.c.bf16 %v363_v0, %v362_v63  ;;  %v390_v5 = vld [vmem:[%s3109_s23 + $0x180] sm:$0xff] }
  0x23   : > { %2601 = vmatprep.mubr.msk.bf16.mxu0 %vm461_vm2, %v410_v22  ;;  %2660 = vmatpush3.bf16.msra.mxu1 %v2916_v34  ;;  %v391_v6 = vld [vmem:[%s3109_s23 + $0x188] sm:$0xff]  ;;  %v2921_v7 = vld [vmem:[%s3829_s3 + $0x30] sm:$0xff]   ;;  %v429_v8 = vpack.c.bf16 %v389_v3, %v388_v2  ;;  %v365_v11 = vld [vmem:[%s3109_s23 + $0xb8] sm:$0xff] }
  0x24   : > { %2661 = vmatprep.subr.bf16.mxu1 %v2917_v43  ;;  %v430_v9 = vpack.c.bf16 %v391_v6, %v390_v5  ;;  %v364_v10 = vld [vmem:[%s3109_s23 + $0xb0] sm:$0xff]  ;;  %v366_v12 = vld [vmem:[%s3109_s23 + $0xc0] sm:$0xff]  ;;  %v367_v13 = vld [vmem:[%s3109_s23 + $0xc8] sm:$0xff] }
  0x25   : > { %v417_v14 = vpack.c.bf16 %v365_v11, %v364_v10  ;;  %v392_v15 = vld [vmem:[%s3109_s23 + $0x190] sm:$0xff]  ;;  %v393_v16 = vld [vmem:[%s3109_s23 + $0x198] sm:$0xff]  ;;  %v418_v17 = vpack.c.bf16 %v367_v13, %v366_v12  ;;  %v394_v18 = vld [vmem:[%s3109_s23 + $0x1a0] sm:$0xff] }
  0x26   : > { %2630 = vmatmul.mubr.msk.bf16.gmra.mrb[4].mxu1 %vm461_vm2, %v425_v44  ;;  %v395_v19 = vld [vmem:[%s3109_s23 + $0x1a8] sm:$0xff]  ;;  %v431_v20 = vpack.c.bf16 %v393_v16, %v392_v15  ;;  %v368_v22 = vld [vmem:[%s3109_s23 + $0xd0] sm:$0xff]  ;;  %v369_v23 = vld [vmem:[%s3109_s23 + $0xd8] sm:$0xff] }
  0x27   : > { %2633 = vmatprep.mubr.msk.bf16.mxu1 %vm461_vm2, %v426_v47  ;;  %2662 = vmatpush3.bf16.msra.mxu1 %v2917_v43  ;;  %v432_v21 = vpack.c.bf16 %v395_v19, %v394_v18  ;;  %v370_v24 = vld [vmem:[%s3109_s23 + $0xe0] sm:$0xff]  ;;  %v371_v25 = vld [vmem:[%s3109_s23 + $0xe8] sm:$0xff]  ;;  %v419_v26 = vpack.c.bf16 %v369_v23, %v368_v22  ;;  %v396_v27 = vld [vmem:[%s3109_s23 + $0x1b0] sm:$0xff] }
  0x28   : > { %2663 = vmatprep.subr.bf16.mxu1 %v2918_v48  ;;  %v397_v28 = vld [vmem:[%s3109_s23 + $0x1b8] sm:$0xff]  ;;  %v420_v29 = vpack.c.bf16 %v371_v25, %v370_v24  ;;  %v398_v30 = vld [vmem:[%s3109_s23 + $0x1c0] sm:$0xff]  ;;  %v399_v31 = vld [vmem:[%s3109_s23 + $0x1c8] sm:$0xff] }
  0x29   : > { %v433_v32 = vpack.c.bf16 %v397_v28, %v396_v27  ;;  %v434_v33 = vpack.c.bf16 %v399_v31, %v398_v30  ;;  %v372_v34 = vld [vmem:[%s3109_s23 + $0xf0] sm:$0xff]  ;;  %v373_v35 = vld [vmem:[%s3109_s23 + $0xf8] sm:$0xff]  ;;  %v402_v39 = vld [vmem:[%s3109_s23 + $0x1e0] sm:$0xff] }
  0x2a   : > { %2602 = vmatmul.mubr.msk.bf16.gmra.mrb[8].mxu0 %vm461_vm2, %v411_v37  ;;  %v421_v36 = vpack.c.bf16 %v373_v35, %v372_v34  ;;  %v400_v37 = vld [vmem:[%s3109_s23 + $0x1d0] sm:$0xff]  ;;  %v401_v38 = vld [vmem:[%s3109_s23 + $0x1d8] sm:$0xff]  ;;  %v3231_v47 = vld [vmem:[%s3828_s2] ss:$0 sm:$0xff] }
  0x2b   : > { %2605 = vmatprep.mubr.msk.bf16.mxu0 %vm461_vm2, %v412_v40  ;;  %2664 = vmatpush3.bf16.msra.mxu1 %v2918_v48  ;;  %v403_v40 = vld [vmem:[%s3109_s23 + $0x1e8] sm:$0xff]  ;;  %v435_v41 = vpack.c.bf16 %v401_v38, %v400_v37  ;;  %v404_v43 = vld [vmem:[%s3109_s23 + $0x1f0] sm:$0xff]  ;;  %v405_v44 = vld [vmem:[%s3109_s23 + $0x1f8] sm:$0xff] }
  0x2c   : > { %2665 = vmatprep.subr.bf16.mxu1 %v2919_v55  ;;  %v436_v42 = vpack.c.bf16 %v403_v40, %v402_v39  ;;  %v437_v45 = vpack.c.bf16 %v405_v44, %v404_v43  ;;  %v2922_v46 = vld [vmem:[%s3829_s3 + $0x38] sm:$0xff]   ;;  %v2924_v60 = vld [vmem:[%s3831_s5 + $0x8] sm:$0xff]   ;;  %v2925_v6 = vld [vmem:[%s3831_s5 + $0x10] sm:$0xff]  }
  0x2d   : > { %v2927_v40 = vld [vmem:[%s3831_s5 + $0x20] sm:$0xff]  }
  0x2e   : > { %2634 = vmatmul.mubr.msk.bf16.gmra.mrb[8].mxu1 %vm461_vm2, %v427_v58 }
  0x2f   : > { %2637 = vmatprep.mubr.msk.bf16.mxu1 %vm461_vm2, %v428_v59  ;;  %2666 = vmatpush3.bf16.msra.mxu1 %v2919_v55  ;;  %v2923_v59 = vld [vmem:[%s3831_s5] sm:$0xff]  }
  0x30   : > { %2667 = vmatprep.subr.bf16.mxu1 %v2920_v62  ;;  %2737 = vmatprep.subr.bf16.mxu0 %v2923_v59 }
  0x31   : > { %2738 = vmatpush3.bf16.msra.mxu0 %v2923_v59 }
  0x32   : > { %2606 = vmatmul.mubr.msk.bf16.gmra.mrb[12].mxu0 %vm461_vm2, %v413_v56  ;;  %2739 = vmatprep.subr.bf16.mxu0 %v2924_v60 }
  0x33   : > { %2609 = vmatprep.mubr.msk.bf16.mxu0 %vm461_vm2, %v414_v57  ;;  %2668 = vmatpush3.bf16.msra.mxu1 %v2920_v62 }
  0x34   : > { %2669 = vmatprep.subr.bf16.mxu1 %v2921_v7 }
  0x35   : > { %2740 = vmatpush3.bf16.msra.mxu0 %v2924_v60  ;;  %v2928_v60 = vld [vmem:[%s3831_s5 + $0x28] sm:$0xff]  }
  0x36   : > { %2638 = vmatmul.mubr.msk.bf16.gmra.mrb[12].mxu1 %vm461_vm2, %v429_v8  ;;  %2741 = vmatprep.subr.bf16.mxu0 %v2925_v6 }
  0x37   : > { %2641 = vmatprep.mubr.msk.bf16.mxu1 %vm461_vm2, %v430_v9  ;;  %2670 = vmatpush3.bf16.msra.mxu1 %v2921_v7 }
  0x38   : > { %2671 = vmatprep.subr.bf16.mxu1 %v2922_v46 }
  0x39   : > { %2742 = vmatpush3.bf16.msra.mxu0 %v2925_v6 }
  0x3a   : > { %2610 = vmatmul.mubr.msk.bf16.gmra.mrb[16].mxu0 %vm461_vm2, %v415_v1 }
  0x3b   : > { %2613 = vmatprep.mubr.msk.bf16.mxu0 %vm461_vm2, %v416_v4  ;;  %2672 = vmatpush3.bf16.msra.mxu1 %v2922_v46 }
  0x3e   : > { %2642 = vmatmul.mubr.msk.bf16.gmra.mrb[16].mxu1 %vm461_vm2, %v431_v20 }
  0x3f   : > { %2645 = vmatprep.mubr.msk.bf16.mxu1 %vm461_vm2, %v432_v21  ;;  %v2926_v21 = vld [vmem:[%s3831_s5 + $0x18] sm:$0xff]  }
  0x40   : > { %2743 = vmatprep.subr.bf16.mxu0 %v2926_v21 }
  0x41   : > { %2744 = vmatpush3.bf16.msra.mxu0 %v2926_v21 }
  0x42   : > { %2614 = vmatmul.mubr.msk.bf16.gmra.mrb[20].mxu0 %vm461_vm2, %v417_v14  ;;  %2745 = vmatprep.subr.bf16.mxu0 %v2927_v40 }
  0x43   : > { %2617 = vmatprep.mubr.msk.bf16.mxu0 %vm461_vm2, %v418_v17 }
  0x45   : > { %2746 = vmatpush3.bf16.msra.mxu0 %v2927_v40 }
  0x46   : > { %2646 = vmatmul.mubr.msk.bf16.gmra.mrb[20].mxu1 %vm461_vm2, %v433_v32  ;;  %2747 = vmatprep.subr.bf16.mxu0 %v2928_v60 }
  0x47   : > { %2649 = vmatprep.mubr.msk.bf16.mxu1 %vm461_vm2, %v434_v33 }
  0x49   : > { %2748 = vmatpush3.bf16.msra.mxu0 %v2928_v60 }
  0x4a   : > { %2618 = vmatmul.mubr.msk.bf16.gmra.mrb[24].mxu0 %vm461_vm2, %v419_v26 }
  0x4b   : > { %2621 = vmatprep.mubr.msk.bf16.mxu0 %vm461_vm2, %v420_v29 }
  0x4e   : > { %2650 = vmatmul.mubr.msk.bf16.gmra.mrb[24].mxu1 %vm461_vm2, %v435_v41 }
  0x4f   : > { %2653 = vmatprep.mubr.msk.bf16.mxu1 %vm461_vm2, %v436_v42 }
  0x52   : > { %2622 = vmatmul.mubr.msk.bf16.gmra.mrb[28].mxu0 %vm461_vm2, %v421_v36 }
  0x56   : > { %2654 = vmatmul.mubr.msk.bf16.gmra.mrb[28].mxu1 %vm461_vm2, %v437_v45 }
  0xed   : > { %v2595_v48 = vpop.f32.mrb[0].mxu0 }
  0xee   : > { %v608_v49 = vadd.f32 %v2595_v48, %v3231_v47  ;;  %v599_v50 = vpop.f32.mrb[1].mxu0 }
  0xef   : > { %v600_v51 = vadd.f32 %v3231_v47, %v599_v50  ;;  %v2596_v52 = vpop.f32.mrb[2].mxu0 }
  0xf0   : > { %v856_v53 = vmul.f32 0.2, %v608_v49  ;;  %v611_v54 = vadd.f32 %v2596_v52, %v3231_v47  ;;  %v602_v55 = vpop.f32.mrb[3].mxu0 }
  0xf1   : > { %v854_v56 = vmul.f32 0.2, %v600_v51  ;;  %v603_v57 = vadd.f32 %v3231_v47, %v602_v55  ;;  %v2627_v13 = vpop.f32.mrb[0].mxu1 }
  0xf2   : > { %v857_v58 = vmul.f32 0.2, %v611_v54  ;;  %v920_v62 = vmax.f32 %v608_v49, %v856_v53  ;;  %v736_v16 = vadd.f32 %v2627_v13, %v3231_v47  ;;  %v727_v17 = vpop.f32.mrb[1].mxu1 }
  0xf3   : > { %v855_v61 = vmul.f32 0.2, %v603_v57  ;;  %v918_v0 = vmax.f32 %v600_v51, %v854_v56  ;;  %v728_v19 = vadd.f32 %v3231_v47, %v727_v17  ;;  %v2628_v20 = vpop.f32.mrb[2].mxu1 }
  0xf4   : > { %v921_v63 = vmax.f32 %v611_v54, %v857_v58  ;;  %v888_v23 = vmul.f32 0.2, %v736_v16  ;;  %v739_v24 = vadd.f32 %v2628_v20, %v3231_v47  ;;  %v730_v25 = vpop.f32.mrb[3].mxu1 }
  0xf5   : > { %v919_v1 = vmax.f32 %v603_v57, %v855_v61  ;;  %v2599_v2 = vpop.f32.mrb[4].mxu0  ;;  %v886_v28 = vmul.f32 0.2, %v728_v19  ;;  %v731_v29 = vadd.f32 %v3231_v47, %v730_v25 }
  0xf6   : > { %v983_v3 = vpack.c.bf16 %v921_v63, %v920_v62  ;;  %v624_v4 = vadd.f32 %v2599_v2, %v3231_v47  ;;  %v615_v5 = vpop.f32.mrb[5].mxu0  ;;  %v952_v33 = vmax.f32 %v736_v16, %v888_v23  ;;  %v889_v34 = vmul.f32 0.2, %v739_v24 }
  0xf7   : > { %v616_v7 = vadd.f32 %v3231_v47, %v615_v5  ;;  %v2600_v8 = vpop.f32.mrb[6].mxu0  ;;  %v982_v9 = vpack.c.bf16 %v919_v1, %v918_v0  ;;  %v950_v38 = vmax.f32 %v728_v19, %v886_v28  ;;  %v887_v39 = vmul.f32 0.2, %v731_v29 }
  0xf8   : > { %v860_v10 = vmul.f32 0.2, %v624_v4  ;;  %v627_v11 = vadd.f32 %v2600_v8, %v3231_v47  ;;  %v618_v12 = vpop.f32.mrb[7].mxu0  ;;  %v953_v44 = vmax.f32 %v739_v24, %v889_v34 }
  0xf9   : > { %v858_v14 = vmul.f32 0.2, %v616_v7  ;;  %v619_v15 = vadd.f32 %v3231_v47, %v618_v12  ;;  %2673 = vmatprep.mubr.bf16.mxu1 %v982_v9  ;;  %v951_v49 = vmax.f32 %v731_v29, %v887_v39  ;;  %v2631_v50 = vpop.f32.mrb[4].mxu1 }
  0xfa   : > { %v861_v18 = vmul.f32 0.2, %v627_v11  ;;  %2674 = vmatmul.mubr.bf16.vlgmr.msra.gmra.mrb[32].mxu1 %v983_v3  ;;  %v924_v26 = vmax.f32 %v624_v4, %v860_v10  ;;  %v752_v53 = vadd.f32 %v2631_v50, %v3231_v47  ;;  %v743_v54 = vpop.f32.mrb[5].mxu1  ;;  %v3265_v55 = vpack.c.bf16 %v953_v44, %v952_v33 }
  0xfb   : > { %v859_v22 = vmul.f32 0.2, %v619_v15  ;;  %v922_v30 = vmax.f32 %v616_v7, %v858_v14  ;;  %v744_v57 = vadd.f32 %v3231_v47, %v743_v54  ;;  %v2632_v58 = vpop.f32.mrb[6].mxu1  ;;  %v3268_v59 = vpack.c.bf16 %v951_v49, %v950_v38 }
  0xfc   : > { %v925_v27 = vmax.f32 %v627_v11, %v861_v18  ;;  %v892_v62 = vmul.f32 0.2, %v752_v53  ;;  %v755_v63 = vadd.f32 %v2632_v58, %v3231_v47  ;;  %v746_v0 = vpop.f32.mrb[7].mxu1 }
  0xfd   : > { %v923_v31 = vmax.f32 %v619_v15, %v859_v22  ;;  %v2603_v32 = vpop.f32.mrb[8].mxu0  ;;  %v890_v3 = vmul.f32 0.2, %v744_v57  ;;  %v747_v4 = vadd.f32 %v3231_v47, %v746_v0  ;;  %v2929_v15 = vld [vmem:[%s3831_s5 + $0x30] sm:$0xff]  }
  0xfe   : > { %v640_v35 = vadd.f32 %v2603_v32, %v3231_v47  ;;  %v631_v36 = vpop.f32.mrb[9].mxu0  ;;  %v985_v37 = vpack.c.bf16 %v925_v27, %v924_v26  ;;  %v956_v8 = vmax.f32 %v752_v53, %v892_v62  ;;  %v893_v9 = vmul.f32 0.2, %v755_v63  ;;  %2749 = vmatprep.subr.bf16.mxu0 %v2929_v15 }
  0xff   : > { %v632_v41 = vadd.f32 %v3231_v47, %v631_v36  ;;  %v2604_v42 = vpop.f32.mrb[10].mxu0  ;;  %v984_v43 = vpack.c.bf16 %v923_v31, %v922_v30  ;;  %v954_v13 = vmax.f32 %v744_v57, %v890_v3  ;;  %v891_v14 = vmul.f32 0.2, %v747_v4  ;;  %2750 = vmatpush3.bf16.msra.mxu0 %v2929_v15 }
 0x100   : > { %v864_v45 = vmul.f32 0.2, %v640_v35  ;;  %v643_v46 = vadd.f32 %v2604_v42, %v3231_v47  ;;  %v634_v48 = vpop.f32.mrb[11].mxu0  ;;  %v957_v19 = vmax.f32 %v755_v63, %v893_v9 }
 0x101   : > { %v862_v51 = vmul.f32 0.2, %v632_v41  ;;  %v635_v52 = vadd.f32 %v3231_v47, %v634_v48  ;;  %2677 = vmatprep.mubr.bf16.mxu1 %v984_v43  ;;  %v955_v23 = vmax.f32 %v747_v4, %v891_v14  ;;  %v2635_v24 = vpop.f32.mrb[8].mxu1 }
 0x102   : > { %v865_v56 = vmul.f32 0.2, %v643_v46  ;;  %2678 = vmatmul.mubr.bf16.gmra.mrb[36].mxu1 %v985_v37  ;;  %v928_v1 = vmax.f32 %v640_v35, %v864_v45  ;;  %v768_v27 = vadd.f32 %v2635_v24, %v3231_v47  ;;  %v759_v28 = vpop.f32.mrb[9].mxu1  ;;  %v3283_v29 = vpack.c.bf16 %v957_v19, %v956_v8 }
 0x103   : > { %v863_v61 = vmul.f32 0.2, %v635_v52  ;;  %v926_v5 = vmax.f32 %v632_v41, %v862_v51  ;;  %v760_v31 = vadd.f32 %v3231_v47, %v759_v28  ;;  %v2636_v32 = vpop.f32.mrb[10].mxu1  ;;  %v3286_v33 = vpack.c.bf16 %v955_v23, %v954_v13 }
 0x104   : > { %v929_v2 = vmax.f32 %v643_v46, %v865_v56  ;;  %v896_v35 = vmul.f32 0.2, %v768_v27  ;;  %v771_v36 = vadd.f32 %v2636_v32, %v3231_v47  ;;  %v762_v37 = vpop.f32.mrb[11].mxu1 }
 0x105   : > { %v927_v6 = vmax.f32 %v635_v52, %v863_v61  ;;  %v2607_v7 = vpop.f32.mrb[12].mxu0  ;;  %v894_v40 = vmul.f32 0.2, %v760_v31  ;;  %v763_v41 = vadd.f32 %v3231_v47, %v762_v37 }
 0x106   : > { %v656_v10 = vadd.f32 %v2607_v7, %v3231_v47  ;;  %v647_v11 = vpop.f32.mrb[13].mxu0  ;;  %v987_v12 = vpack.c.bf16 %v929_v2, %v928_v1  ;;  %v960_v45 = vmax.f32 %v768_v27, %v896_v35  ;;  %v897_v46 = vmul.f32 0.2, %v771_v36 }
 0x107   : > { %v648_v16 = vadd.f32 %v3231_v47, %v647_v11  ;;  %v2608_v17 = vpop.f32.mrb[14].mxu0  ;;  %v986_v18 = vpack.c.bf16 %v927_v6, %v926_v5  ;;  %v958_v51 = vmax.f32 %v760_v31, %v894_v40  ;;  %v895_v52 = vmul.f32 0.2, %v763_v41 }
 0x108   : > { %v868_v20 = vmul.f32 0.2, %v656_v10  ;;  %v659_v21 = vadd.f32 %v2608_v17, %v3231_v47  ;;  %v650_v22 = vpop.f32.mrb[15].mxu0  ;;  %v961_v57 = vmax.f32 %v771_v36, %v897_v46 }
 0x109   : > { %v866_v25 = vmul.f32 0.2, %v648_v16  ;;  %v651_v26 = vadd.f32 %v3231_v47, %v650_v22  ;;  %2681 = vmatprep.mubr.bf16.mxu1 %v986_v18  ;;  %v959_v62 = vmax.f32 %v763_v41, %v895_v52  ;;  %v2639_v63 = vpop.f32.mrb[12].mxu1 }
 0x10a   : > { %v869_v30 = vmul.f32 0.2, %v659_v21  ;;  %2682 = vmatmul.mubr.bf16.gmra.mrb[40].mxu1 %v987_v12  ;;  %v932_v38 = vmax.f32 %v656_v10, %v868_v20  ;;  %v784_v2 = vadd.f32 %v2639_v63, %v3231_v47  ;;  %v775_v3 = vpop.f32.mrb[13].mxu1  ;;  %v3295_v4 = vpack.c.bf16 %v961_v57, %v960_v45 }
 0x10b   : > { %v867_v34 = vmul.f32 0.2, %v651_v26  ;;  %v930_v42 = vmax.f32 %v648_v16, %v866_v25  ;;  %v776_v6 = vadd.f32 %v3231_v47, %v775_v3  ;;  %v2640_v7 = vpop.f32.mrb[14].mxu1  ;;  %v3298_v8 = vpack.c.bf16 %v959_v62, %v958_v51 }
 0x10c   : > { %v933_v39 = vmax.f32 %v659_v21, %v869_v30  ;;  %v900_v10 = vmul.f32 0.2, %v784_v2  ;;  %v787_v11 = vadd.f32 %v2640_v7, %v3231_v47  ;;  %v778_v12 = vpop.f32.mrb[15].mxu1 }
 0x10d   : > { %v931_v43 = vmax.f32 %v651_v26, %v867_v34  ;;  %v2611_v44 = vpop.f32.mrb[16].mxu0  ;;  %v898_v15 = vmul.f32 0.2, %v776_v6  ;;  %v779_v16 = vadd.f32 %v3231_v47, %v778_v12 }
 0x10e   : > { %v672_v48 = vadd.f32 %v2611_v44, %v3231_v47  ;;  %v663_v49 = vpop.f32.mrb[17].mxu0  ;;  %v989_v50 = vpack.c.bf16 %v933_v39, %v932_v38  ;;  %v964_v20 = vmax.f32 %v784_v2, %v900_v10  ;;  %v901_v21 = vmul.f32 0.2, %v787_v11 }
 0x10f   : > { %v664_v53 = vadd.f32 %v3231_v47, %v663_v49  ;;  %v2612_v54 = vpop.f32.mrb[18].mxu0  ;;  %v988_v56 = vpack.c.bf16 %v931_v43, %v930_v42  ;;  %v962_v25 = vmax.f32 %v776_v6, %v898_v15  ;;  %v899_v26 = vmul.f32 0.2, %v779_v16 }
 0x110   : > { %v872_v58 = vmul.f32 0.2, %v672_v48  ;;  %v675_v60 = vadd.f32 %v2612_v54, %v3231_v47  ;;  %v666_v61 = vpop.f32.mrb[19].mxu0  ;;  %v965_v31 = vmax.f32 %v787_v11, %v901_v21 }
 0x111   : > { %v870_v0 = vmul.f32 0.2, %v664_v53  ;;  %v667_v1 = vadd.f32 %v3231_v47, %v666_v61  ;;  %2685 = vmatprep.mubr.bf16.mxu1 %v988_v56  ;;  %v963_v36 = vmax.f32 %v779_v16, %v899_v26  ;;  %v2643_v37 = vpop.f32.mrb[16].mxu1 }
 0x112   : > { %v873_v5 = vmul.f32 0.2, %v675_v60  ;;  %2686 = vmatmul.mubr.bf16.gmra.mrb[44].mxu1 %v989_v50  ;;  %v936_v13 = vmax.f32 %v672_v48, %v872_v58  ;;  %v800_v40 = vadd.f32 %v2643_v37, %v3231_v47  ;;  %v791_v41 = vpop.f32.mrb[17].mxu1  ;;  %v3307_v42 = vpack.c.bf16 %v965_v31, %v964_v20 }
 0x113   : > { %v871_v9 = vmul.f32 0.2, %v667_v1  ;;  %v934_v17 = vmax.f32 %v664_v53, %v870_v0  ;;  %v792_v44 = vadd.f32 %v3231_v47, %v791_v41  ;;  %v2644_v45 = vpop.f32.mrb[18].mxu1  ;;  %v3310_v46 = vpack.c.bf16 %v963_v36, %v962_v25 }
 0x114   : > { %v937_v14 = vmax.f32 %v675_v60, %v873_v5  ;;  %v904_v49 = vmul.f32 0.2, %v800_v40  ;;  %v803_v50 = vadd.f32 %v2644_v45, %v3231_v47  ;;  %v794_v51 = vpop.f32.mrb[19].mxu1 }
 0x115   : > { %v935_v18 = vmax.f32 %v667_v1, %v871_v9  ;;  %v2615_v19 = vpop.f32.mrb[20].mxu0  ;;  %v902_v54 = vmul.f32 0.2, %v792_v44  ;;  %v795_v56 = vadd.f32 %v3231_v47, %v794_v51 }
 0x116   : > { %v688_v22 = vadd.f32 %v2615_v19, %v3231_v47  ;;  %v679_v23 = vpop.f32.mrb[21].mxu0  ;;  %v991_v24 = vpack.c.bf16 %v937_v14, %v936_v13  ;;  %v968_v61 = vmax.f32 %v800_v40, %v904_v49  ;;  %v905_v62 = vmul.f32 0.2, %v803_v50 }
 0x117   : > { %v680_v27 = vadd.f32 %v3231_v47, %v679_v23  ;;  %v2616_v28 = vpop.f32.mrb[22].mxu0  ;;  %v990_v30 = vpack.c.bf16 %v935_v18, %v934_v17  ;;  %v966_v2 = vmax.f32 %v792_v44, %v902_v54  ;;  %v903_v3 = vmul.f32 0.2, %v795_v56 }
 0x118   : > { %v876_v32 = vmul.f32 0.2, %v688_v22  ;;  %v691_v34 = vadd.f32 %v2616_v28, %v3231_v47  ;;  %v682_v35 = vpop.f32.mrb[23].mxu0  ;;  %v969_v9 = vmax.f32 %v803_v50, %v905_v62 }
 0x119   : > { %v874_v38 = vmul.f32 0.2, %v680_v27  ;;  %v683_v39 = vadd.f32 %v3231_v47, %v682_v35  ;;  %2689 = vmatprep.mubr.bf16.mxu1 %v990_v30  ;;  %v967_v13 = vmax.f32 %v795_v56, %v903_v3  ;;  %v2647_v14 = vpop.f32.mrb[20].mxu1 }
 0x11a   : > { %v877_v43 = vmul.f32 0.2, %v691_v34  ;;  %2690 = vmatmul.mubr.bf16.gmra.mrb[48].mxu1 %v991_v24  ;;  %v940_v52 = vmax.f32 %v688_v22, %v876_v32  ;;  %v816_v17 = vadd.f32 %v2647_v14, %v3231_v47  ;;  %v807_v18 = vpop.f32.mrb[21].mxu1  ;;  %v3319_v19 = vpack.c.bf16 %v969_v9, %v968_v61 }
 0x11b   : > { %v875_v48 = vmul.f32 0.2, %v683_v39  ;;  %v938_v57 = vmax.f32 %v680_v27, %v874_v38  ;;  %v808_v21 = vadd.f32 %v3231_v47, %v807_v18  ;;  %v2648_v22 = vpop.f32.mrb[22].mxu1  ;;  %v3322_v23 = vpack.c.bf16 %v967_v13, %v966_v2 }
 0x11c   : > { %v941_v53 = vmax.f32 %v691_v34, %v877_v43  ;;  %v908_v25 = vmul.f32 0.2, %v816_v17  ;;  %v819_v26 = vadd.f32 %v2648_v22, %v3231_v47  ;;  %v810_v27 = vpop.f32.mrb[23].mxu1 }
 0x11d   : > { %v939_v58 = vmax.f32 %v683_v39, %v875_v48  ;;  %v2619_v60 = vpop.f32.mrb[24].mxu0  ;;  %v906_v31 = vmul.f32 0.2, %v808_v21  ;;  %v811_v32 = vadd.f32 %v3231_v47, %v810_v27 }
 0x11e   : > { %v704_v63 = vadd.f32 %v2619_v60, %v3231_v47  ;;  %v695_v0 = vpop.f32.mrb[25].mxu0  ;;  %v993_v1 = vpack.c.bf16 %v941_v53, %v940_v52  ;;  %v972_v37 = vmax.f32 %v816_v17, %v908_v25  ;;  %v909_v38 = vmul.f32 0.2, %v819_v26 }
 0x11f   : > { %v696_v5 = vadd.f32 %v3231_v47, %v695_v0  ;;  %v2620_v6 = vpop.f32.mrb[26].mxu0  ;;  %v992_v7 = vpack.c.bf16 %v939_v58, %v938_v57  ;;  %v970_v43 = vmax.f32 %v808_v21, %v906_v31  ;;  %v907_v44 = vmul.f32 0.2, %v811_v32 }
 0x120   : > { %v880_v10 = vmul.f32 0.2, %v704_v63  ;;  %v707_v11 = vadd.f32 %v2620_v6, %v3231_v47  ;;  %v698_v12 = vpop.f32.mrb[27].mxu0  ;;  %v973_v50 = vmax.f32 %v819_v26, %v909_v38 }
 0x121   : > { %v878_v15 = vmul.f32 0.2, %v696_v5  ;;  %v699_v16 = vadd.f32 %v3231_v47, %v698_v12  ;;  %2693 = vmatprep.mubr.bf16.mxu1 %v992_v7  ;;  %v971_v54 = vmax.f32 %v811_v32, %v907_v44  ;;  %v2651_v56 = vpop.f32.mrb[24].mxu1 }
 0x122   : > { %v881_v20 = vmul.f32 0.2, %v707_v11  ;;  %2694 = vmatmul.mubr.bf16.gmra.mrb[52].mxu1 %v993_v1  ;;  %v944_v28 = vmax.f32 %v704_v63, %v880_v10  ;;  %v832_v60 = vadd.f32 %v2651_v56, %v3231_v47  ;;  %v823_v61 = vpop.f32.mrb[25].mxu1  ;;  %v1009_v62 = vpack.c.bf16 %v973_v50, %v972_v37 }
 0x123   : > { %v879_v24 = vmul.f32 0.2, %v699_v16  ;;  %v942_v34 = vmax.f32 %v696_v5, %v878_v15  ;;  %v824_v0 = vadd.f32 %v3231_v47, %v823_v61  ;;  %v2652_v1 = vpop.f32.mrb[26].mxu1  ;;  %v1008_v2 = vpack.c.bf16 %v971_v54, %v970_v43 }
 0x124   : > { %v945_v30 = vmax.f32 %v707_v11, %v881_v20  ;;  %v912_v5 = vmul.f32 0.2, %v832_v60  ;;  %v835_v6 = vadd.f32 %v2652_v1, %v3231_v47  ;;  %v826_v7 = vpop.f32.mrb[27].mxu1 }
 0x125   : > { %v943_v35 = vmax.f32 %v699_v16, %v879_v24  ;;  %v2623_v36 = vpop.f32.mrb[28].mxu0  ;;  %v910_v11 = vmul.f32 0.2, %v824_v0  ;;  %v827_v12 = vadd.f32 %v3231_v47, %v826_v7 }
 0x126   : > { %v720_v39 = vadd.f32 %v2623_v36, %v3231_v47  ;;  %v711_v40 = vpop.f32.mrb[29].mxu0  ;;  %v995_v41 = vpack.c.bf16 %v945_v30, %v944_v28  ;;  %v976_v15 = vmax.f32 %v832_v60, %v912_v5  ;;  %v913_v16 = vmul.f32 0.2, %v835_v6 }
 0x127   : > { %v712_v45 = vadd.f32 %v3231_v47, %v711_v40  ;;  %v2624_v48 = vpop.f32.mrb[30].mxu0  ;;  %v994_v49 = vpack.c.bf16 %v943_v35, %v942_v34  ;;  %v974_v18 = vmax.f32 %v824_v0, %v910_v11  ;;  %v911_v20 = vmul.f32 0.2, %v827_v12 }
 0x128   : > { %v884_v51 = vmul.f32 0.2, %v720_v39  ;;  %v723_v52 = vadd.f32 %v2624_v48, %v3231_v47  ;;  %v714_v53 = vpop.f32.mrb[31].mxu0  ;;  %v977_v22 = vmax.f32 %v835_v6, %v913_v16 }
 0x129   : > { %v882_v57 = vmul.f32 0.2, %v712_v45  ;;  %v715_v58 = vadd.f32 %v3231_v47, %v714_v53  ;;  %2697 = vmatprep.mubr.bf16.mxu1 %v994_v49  ;;  %v975_v24 = vmax.f32 %v827_v12, %v911_v20  ;;  %v2655_v25 = vpop.f32.mrb[28].mxu1 }
 0x12a   : > { %v885_v63 = vmul.f32 0.2, %v723_v52  ;;  %2698 = vmatmul.mubr.bf16.gmra.mrb[56].mxu1 %v995_v41  ;;  %v948_v9 = vmax.f32 %v720_v39, %v884_v51  ;;  %v848_v26 = vadd.f32 %v2655_v25, %v3231_v47  ;;  %v839_v27 = vpop.f32.mrb[29].mxu1  ;;  %v1011_v28 = vpack.c.bf16 %v977_v22, %v976_v15 }
 0x12b   : > { %v883_v3 = vmul.f32 0.2, %v715_v58  ;;  %v946_v13 = vmax.f32 %v712_v45, %v882_v57  ;;  %v840_v30 = vadd.f32 %v3231_v47, %v839_v27  ;;  %v2656_v31 = vpop.f32.mrb[30].mxu1  ;;  %v1010_v32 = vpack.c.bf16 %v975_v24, %v974_v18 }
 0x12c   : > { %v949_v10 = vmax.f32 %v723_v52, %v885_v63  ;;  %v916_v34 = vmul.f32 0.2, %v848_v26  ;;  %v851_v35 = vadd.f32 %v2656_v31, %v3231_v47  ;;  %v842_v36 = vpop.f32.mrb[31].mxu1 }
 0x12d   : > { %v947_v14 = vmax.f32 %v715_v58, %v883_v3  ;;  %v914_v37 = vmul.f32 0.2, %v840_v30  ;;  %v843_v38 = vadd.f32 %v3231_v47, %v842_v36  ;;  %v2930_v47 = vld [vmem:[%s3831_s5 + $0x38] sm:$0xff]  }
 0x12e   : > { %v997_v17 = vpack.c.bf16 %v949_v10, %v948_v9  ;;  %v980_v39 = vmax.f32 %v848_v26, %v916_v34  ;;  %v917_v40 = vmul.f32 0.2, %v851_v35  ;;  %2751 = vmatprep.subr.bf16.mxu0 %v2930_v47 }
 0x12f   : > { %v996_v21 = vpack.c.bf16 %v947_v14, %v946_v13  ;;  %v978_v41 = vmax.f32 %v840_v30, %v914_v37  ;;  %v915_v43 = vmul.f32 0.2, %v843_v38  ;;  %2752 = vmatpush3.bf16.msra.mxu0 %v2930_v47 }
 0x130   : > { %v981_v44 = vmax.f32 %v851_v35, %v917_v40 }
 0x131   : > { %2701 = vmatprep.mubr.bf16.mxu1 %v996_v21  ;;  %v979_v45 = vmax.f32 %v843_v38, %v915_v43 }
 0x132   : > { %2702 = vmatmul.mubr.bf16.gmra.mrb[60].mxu1 %v997_v17  ;;  %v1013_v48 = vpack.c.bf16 %v981_v44, %v980_v39 }
 0x133   : > { %2705 = vmatprep.mubr.bf16.mxu1 %v3268_v59  ;;  %v1012_v49 = vpack.c.bf16 %v979_v45, %v978_v41 }
 0x13a   : > { %2706 = vmatmul.mubr.bf16.gmra.mrb[64].mxu1 %v3265_v55  ;;  %v3354_v55 = vld [vmem:[%s3830_s4] ss:$0 sm:$0xff] }
 0x13b   : > { %2709 = vmatprep.mubr.bf16.mxu1 %v3286_v33 }
 0x142   : > { %2710 = vmatmul.mubr.bf16.gmra.mrb[68].mxu1 %v3283_v29 }
 0x143   : > { %2713 = vmatprep.mubr.bf16.mxu1 %v3298_v8 }
 0x14a   : > { %2714 = vmatmul.mubr.bf16.gmra.mrb[72].mxu1 %v3295_v4 }
 0x14b   : > { %2717 = vmatprep.mubr.bf16.mxu1 %v3310_v46 }
 0x152   : > { %2718 = vmatmul.mubr.bf16.gmra.mrb[76].mxu1 %v3307_v42 }
 0x153   : > { %2721 = vmatprep.mubr.bf16.mxu1 %v3322_v23 }
 0x15a   : > { %2722 = vmatmul.mubr.bf16.gmra.mrb[80].mxu1 %v3319_v19 }
 0x15b   : > { %2725 = vmatprep.mubr.bf16.mxu1 %v1008_v2 }
 0x162   : > { %2726 = vmatmul.mubr.bf16.gmra.mrb[84].mxu1 %v1009_v62 }
 0x163   : > { %2729 = vmatprep.mubr.bf16.mxu1 %v1010_v32 }
 0x16a   : > { %2730 = vmatmul.mubr.bf16.gmra.mrb[88].mxu1 %v1011_v28 }
 0x16b   : > { %2733 = vmatprep.mubr.bf16.mxu1 %v1012_v49 }
 0x172   : > { %2734 = vmatmul.mubr.bf16.gmra.mrb[92].mxu1 %v1013_v48 }
 0x1cd   : > { %v2675_v59 = vpop.f32.mrb[32].mxu1 }
 0x1ce   : > { %v1111_v29 = vadd.f32 %v2675_v59, %v3354_v55  ;;  %v1102_v33 = vpop.f32.mrb[33].mxu1 }
 0x1cf   : > { %v1103_v4 = vadd.f32 %v3354_v55, %v1102_v33  ;;  %v2676_v8 = vpop.f32.mrb[34].mxu1 }
 0x1d0   : > { %v1359_v42 = vmul.f32 0.2, %v1111_v29  ;;  %v1114_v46 = vadd.f32 %v2676_v8, %v3354_v55  ;;  %v1105_v19 = vpop.f32.mrb[35].mxu1 }
 0x1d1   : > { %v1357_v23 = vmul.f32 0.2, %v1103_v4  ;;  %v1106_v50 = vadd.f32 %v3354_v55, %v1105_v19 }
 0x1d2   : > { %v1360_v51 = vmul.f32 0.2, %v1114_v46  ;;  %v1423_v53 = vmax.f32 %v1111_v29, %v1359_v42 }
 0x1d3   : > { %v1358_v52 = vmul.f32 0.2, %v1106_v50  ;;  %v1421_v56 = vmax.f32 %v1103_v4, %v1357_v23 }
 0x1d4   : > { %v1424_v54 = vmax.f32 %v1114_v46, %v1360_v51 }
 0x1d5   : > { %v1422_v57 = vmax.f32 %v1106_v50, %v1358_v52  ;;  %v2679_v58 = vpop.f32.mrb[36].mxu1 }
 0x1d6   : > { %v1486_v60 = vpack.c.bf16 %v1424_v54, %v1423_v53  ;;  %v1127_v61 = vadd.f32 %v2679_v58, %v3354_v55  ;;  %v1118_v62 = vpop.f32.mrb[37].mxu1 }
 0x1d7   : > { %v1119_v63 = vadd.f32 %v3354_v55, %v1118_v62  ;;  %v2680_v0 = vpop.f32.mrb[38].mxu1  ;;  %v1485_v1 = vpack.c.bf16 %v1422_v57, %v1421_v56 }
 0x1d8   : > { %v1363_v2 = vmul.f32 0.2, %v1127_v61  ;;  %v1130_v3 = vadd.f32 %v2680_v0, %v3354_v55  ;;  %v1121_v5 = vpop.f32.mrb[39].mxu1 }
 0x1d9   : > { %v1361_v6 = vmul.f32 0.2, %v1119_v63  ;;  %v1122_v7 = vadd.f32 %v3354_v55, %v1121_v5  ;;  %2753 = vmatprep.mubr.bf16.mxu0 %v1485_v1 }
 0x1da   : > { %v1364_v9 = vmul.f32 0.2, %v1130_v3  ;;  %2754 = vmatmul.mubr.bf16.vlgmr.msra.gmra.mrb[32].mxu0 %v1486_v60  ;;  %v1427_v11 = vmax.f32 %v1127_v61, %v1363_v2 }
 0x1db   : > { %v1362_v10 = vmul.f32 0.2, %v1122_v7  ;;  %v1425_v13 = vmax.f32 %v1119_v63, %v1361_v6 }
 0x1dc   : > { %v1428_v12 = vmax.f32 %v1130_v3, %v1364_v9 }
 0x1dd   : > { %v1426_v14 = vmax.f32 %v1122_v7, %v1362_v10  ;;  %v2683_v15 = vpop.f32.mrb[40].mxu1 }
 0x1de   : > { %v1143_v16 = vadd.f32 %v2683_v15, %v3354_v55  ;;  %v1134_v17 = vpop.f32.mrb[41].mxu1  ;;  %v1488_v18 = vpack.c.bf16 %v1428_v12, %v1427_v11 }
 0x1df   : > { %v1135_v20 = vadd.f32 %v3354_v55, %v1134_v17  ;;  %v2684_v21 = vpop.f32.mrb[42].mxu1  ;;  %v1487_v22 = vpack.c.bf16 %v1426_v14, %v1425_v13 }
 0x1e0   : > { %v1367_v24 = vmul.f32 0.2, %v1143_v16  ;;  %v1146_v25 = vadd.f32 %v2684_v21, %v3354_v55  ;;  %v1137_v26 = vpop.f32.mrb[43].mxu1 }
 0x1e1   : > { %v1365_v27 = vmul.f32 0.2, %v1135_v20  ;;  %v1138_v28 = vadd.f32 %v3354_v55, %v1137_v26  ;;  %2757 = vmatprep.mubr.bf16.mxu0 %v1487_v22 }
 0x1e2   : > { %v1368_v30 = vmul.f32 0.2, %v1146_v25  ;;  %2758 = vmatmul.mubr.bf16.gmra.mrb[36].mxu0 %v1488_v18  ;;  %v1431_v32 = vmax.f32 %v1143_v16, %v1367_v24 }
 0x1e3   : > { %v1366_v31 = vmul.f32 0.2, %v1138_v28  ;;  %v1429_v35 = vmax.f32 %v1135_v20, %v1365_v27 }
 0x1e4   : > { %v1432_v34 = vmax.f32 %v1146_v25, %v1368_v30 }
 0x1e5   : > { %v1430_v36 = vmax.f32 %v1138_v28, %v1366_v31  ;;  %v2687_v37 = vpop.f32.mrb[44].mxu1 }
 0x1e6   : > { %v1159_v38 = vadd.f32 %v2687_v37, %v3354_v55  ;;  %v1150_v39 = vpop.f32.mrb[45].mxu1  ;;  %v1490_v40 = vpack.c.bf16 %v1432_v34, %v1431_v32 }
 0x1e7   : > { %v1151_v41 = vadd.f32 %v3354_v55, %v1150_v39  ;;  %v2688_v43 = vpop.f32.mrb[46].mxu1  ;;  %v1489_v44 = vpack.c.bf16 %v1430_v36, %v1429_v35 }
 0x1e8   : > { %v1371_v45 = vmul.f32 0.2, %v1159_v38  ;;  %v1162_v48 = vadd.f32 %v2688_v43, %v3354_v55  ;;  %v1153_v49 = vpop.f32.mrb[47].mxu1 }
 0x1e9   : > { %v1369_v47 = vmul.f32 0.2, %v1151_v41  ;;  %v1154_v59 = vadd.f32 %v3354_v55, %v1153_v49  ;;  %2761 = vmatprep.mubr.bf16.mxu0 %v1489_v44 }
 0x1ea   : > { %v1372_v29 = vmul.f32 0.2, %v1162_v48  ;;  %2762 = vmatmul.mubr.bf16.gmra.mrb[40].mxu0 %v1490_v40  ;;  %v1435_v4 = vmax.f32 %v1159_v38, %v1371_v45 }
 0x1eb   : > { %v1370_v33 = vmul.f32 0.2, %v1154_v59  ;;  %v1433_v42 = vmax.f32 %v1151_v41, %v1369_v47 }
 0x1ec   : > { %v1436_v8 = vmax.f32 %v1162_v48, %v1372_v29 }
 0x1ed   : > { %v1434_v46 = vmax.f32 %v1154_v59, %v1370_v33  ;;  %v2691_v19 = vpop.f32.mrb[48].mxu1 }
 0x1ee   : > { %v1175_v23 = vadd.f32 %v2691_v19, %v3354_v55  ;;  %v1166_v50 = vpop.f32.mrb[49].mxu1  ;;  %v1492_v51 = vpack.c.bf16 %v1436_v8, %v1435_v4 }
 0x1ef   : > { %v1167_v52 = vadd.f32 %v3354_v55, %v1166_v50  ;;  %v2692_v53 = vpop.f32.mrb[50].mxu1  ;;  %v1491_v54 = vpack.c.bf16 %v1434_v46, %v1433_v42 }
 0x1f0   : > { %v1375_v56 = vmul.f32 0.2, %v1175_v23  ;;  %v1178_v57 = vadd.f32 %v2692_v53, %v3354_v55  ;;  %v1169_v58 = vpop.f32.mrb[51].mxu1 }
 0x1f1   : > { %v1373_v60 = vmul.f32 0.2, %v1167_v52  ;;  %v1170_v61 = vadd.f32 %v3354_v55, %v1169_v58  ;;  %2765 = vmatprep.mubr.bf16.mxu0 %v1491_v54 }
 0x1f2   : > { %v1376_v62 = vmul.f32 0.2, %v1178_v57  ;;  %2766 = vmatmul.mubr.bf16.gmra.mrb[44].mxu0 %v1492_v51  ;;  %v1439_v0 = vmax.f32 %v1175_v23, %v1375_v56 }
 0x1f3   : > { %v1374_v63 = vmul.f32 0.2, %v1170_v61  ;;  %v1437_v2 = vmax.f32 %v1167_v52, %v1373_v60 }
 0x1f4   : > { %v1440_v1 = vmax.f32 %v1178_v57, %v1376_v62 }
 0x1f5   : > { %v1438_v3 = vmax.f32 %v1170_v61, %v1374_v63  ;;  %v2695_v5 = vpop.f32.mrb[52].mxu1 }
 0x1f6   : > { %v1191_v6 = vadd.f32 %v2695_v5, %v3354_v55  ;;  %v1182_v7 = vpop.f32.mrb[53].mxu1  ;;  %v1494_v9 = vpack.c.bf16 %v1440_v1, %v1439_v0 }
 0x1f7   : > { %v1183_v10 = vadd.f32 %v3354_v55, %v1182_v7  ;;  %v2696_v11 = vpop.f32.mrb[54].mxu1  ;;  %v1493_v12 = vpack.c.bf16 %v1438_v3, %v1437_v2 }
 0x1f8   : > { %v1379_v13 = vmul.f32 0.2, %v1191_v6  ;;  %v1194_v14 = vadd.f32 %v2696_v11, %v3354_v55  ;;  %v1185_v15 = vpop.f32.mrb[55].mxu1 }
 0x1f9   : > { %v1377_v16 = vmul.f32 0.2, %v1183_v10  ;;  %v1186_v17 = vadd.f32 %v3354_v55, %v1185_v15  ;;  %2769 = vmatprep.mubr.bf16.mxu0 %v1493_v12 }
 0x1fa   : > { %v1380_v18 = vmul.f32 0.2, %v1194_v14  ;;  %2770 = vmatmul.mubr.bf16.gmra.mrb[48].mxu0 %v1494_v9  ;;  %v1443_v21 = vmax.f32 %v1191_v6, %v1379_v13 }
 0x1fb   : > { %v1378_v20 = vmul.f32 0.2, %v1186_v17  ;;  %v1441_v24 = vmax.f32 %v1183_v10, %v1377_v16 }
 0x1fc   : > { %v1444_v22 = vmax.f32 %v1194_v14, %v1380_v18 }
 0x1fd   : > { %v1442_v25 = vmax.f32 %v1186_v17, %v1378_v20  ;;  %v2699_v26 = vpop.f32.mrb[56].mxu1 }
 0x1fe   : > { %v1207_v27 = vadd.f32 %v2699_v26, %v3354_v55  ;;  %v1198_v28 = vpop.f32.mrb[57].mxu1  ;;  %v1496_v30 = vpack.c.bf16 %v1444_v22, %v1443_v21 }
 0x1ff   : > { %v1199_v31 = vadd.f32 %v3354_v55, %v1198_v28  ;;  %v2700_v32 = vpop.f32.mrb[58].mxu1  ;;  %v1495_v34 = vpack.c.bf16 %v1442_v25, %v1441_v24 }
 0x200   : > { %v1383_v35 = vmul.f32 0.2, %v1207_v27  ;;  %v1210_v36 = vadd.f32 %v2700_v32, %v3354_v55  ;;  %v1201_v37 = vpop.f32.mrb[59].mxu1 }
 0x201   : > { %v1381_v38 = vmul.f32 0.2, %v1199_v31  ;;  %v1202_v39 = vadd.f32 %v3354_v55, %v1201_v37  ;;  %2773 = vmatprep.mubr.bf16.mxu0 %v1495_v34 }
 0x202   : > { %v1384_v40 = vmul.f32 0.2, %v1210_v36  ;;  %2774 = vmatmul.mubr.bf16.gmra.mrb[52].mxu0 %v1496_v30  ;;  %v1447_v43 = vmax.f32 %v1207_v27, %v1383_v35 }
 0x203   : > { %v1382_v41 = vmul.f32 0.2, %v1202_v39  ;;  %v1445_v45 = vmax.f32 %v1199_v31, %v1381_v38 }
 0x204   : > { %v1448_v44 = vmax.f32 %v1210_v36, %v1384_v40 }
 0x205   : > { %v1446_v48 = vmax.f32 %v1202_v39, %v1382_v41  ;;  %v2703_v49 = vpop.f32.mrb[60].mxu1 }
 0x206   : > { %v1223_v47 = vadd.f32 %v2703_v49, %v3354_v55  ;;  %v1214_v59 = vpop.f32.mrb[61].mxu1  ;;  %v1498_v29 = vpack.c.bf16 %v1448_v44, %v1447_v43 }
 0x207   : > { %v1215_v33 = vadd.f32 %v3354_v55, %v1214_v59  ;;  %v2704_v4 = vpop.f32.mrb[62].mxu1  ;;  %v1497_v8 = vpack.c.bf16 %v1446_v48, %v1445_v45 }
 0x208   : > { %v1387_v42 = vmul.f32 0.2, %v1223_v47  ;;  %v1226_v46 = vadd.f32 %v2704_v4, %v3354_v55  ;;  %v1217_v19 = vpop.f32.mrb[63].mxu1 }
 0x209   : > { %v1385_v23 = vmul.f32 0.2, %v1215_v33  ;;  %v1218_v50 = vadd.f32 %v3354_v55, %v1217_v19  ;;  %2777 = vmatprep.mubr.bf16.mxu0 %v1497_v8 }
 0x20a   : > { %v1388_v51 = vmul.f32 0.2, %v1226_v46  ;;  %2778 = vmatmul.mubr.bf16.gmra.mrb[56].mxu0 %v1498_v29  ;;  %v1451_v53 = vmax.f32 %v1223_v47, %v1387_v42 }
 0x20b   : > { %v1386_v52 = vmul.f32 0.2, %v1218_v50  ;;  %v1449_v56 = vmax.f32 %v1215_v33, %v1385_v23 }
 0x20c   : > { %v1452_v54 = vmax.f32 %v1226_v46, %v1388_v51 }
 0x20d   : > { %v1450_v57 = vmax.f32 %v1218_v50, %v1386_v52  ;;  %v2707_v58 = vpop.f32.mrb[64].mxu1 }
 0x20e   : > { %v1239_v60 = vadd.f32 %v2707_v58, %v3354_v55  ;;  %v1230_v61 = vpop.f32.mrb[65].mxu1  ;;  %v1500_v62 = vpack.c.bf16 %v1452_v54, %v1451_v53 }
 0x20f   : > { %v1231_v63 = vadd.f32 %v3354_v55, %v1230_v61  ;;  %v2708_v0 = vpop.f32.mrb[66].mxu1  ;;  %v1499_v1 = vpack.c.bf16 %v1450_v57, %v1449_v56 }
 0x210   : > { %v1391_v2 = vmul.f32 0.2, %v1239_v60  ;;  %v1242_v3 = vadd.f32 %v2708_v0, %v3354_v55  ;;  %v1233_v5 = vpop.f32.mrb[67].mxu1 }
 0x211   : > { %v1389_v6 = vmul.f32 0.2, %v1231_v63  ;;  %v1234_v7 = vadd.f32 %v3354_v55, %v1233_v5  ;;  %2781 = vmatprep.mubr.bf16.mxu0 %v1499_v1 }
 0x212   : > { %v1392_v9 = vmul.f32 0.2, %v1242_v3  ;;  %2782 = vmatmul.mubr.bf16.gmra.mrb[60].mxu0 %v1500_v62  ;;  %v1455_v11 = vmax.f32 %v1239_v60, %v1391_v2 }
 0x213   : > { %v1390_v10 = vmul.f32 0.2, %v1234_v7  ;;  %v1453_v13 = vmax.f32 %v1231_v63, %v1389_v6 }
 0x214   : > { %v1456_v12 = vmax.f32 %v1242_v3, %v1392_v9 }
 0x215   : > { %v1454_v14 = vmax.f32 %v1234_v7, %v1390_v10  ;;  %v2711_v15 = vpop.f32.mrb[68].mxu1 }
 0x216   : > { %v1255_v16 = vadd.f32 %v2711_v15, %v3354_v55  ;;  %v1246_v17 = vpop.f32.mrb[69].mxu1  ;;  %v1502_v18 = vpack.c.bf16 %v1456_v12, %v1455_v11 }
 0x217   : > { %v1247_v20 = vadd.f32 %v3354_v55, %v1246_v17  ;;  %v2712_v21 = vpop.f32.mrb[70].mxu1  ;;  %v1501_v22 = vpack.c.bf16 %v1454_v14, %v1453_v13 }
 0x218   : > { %v1395_v24 = vmul.f32 0.2, %v1255_v16  ;;  %v1258_v25 = vadd.f32 %v2712_v21, %v3354_v55  ;;  %v1249_v26 = vpop.f32.mrb[71].mxu1 }
 0x219   : > { %v1393_v27 = vmul.f32 0.2, %v1247_v20  ;;  %v1250_v28 = vadd.f32 %v3354_v55, %v1249_v26  ;;  %2785 = vmatprep.mubr.bf16.mxu0 %v1501_v22 }
 0x21a   : > { %v1396_v30 = vmul.f32 0.2, %v1258_v25  ;;  %2786 = vmatmul.mubr.bf16.gmra.mrb[64].mxu0 %v1502_v18  ;;  %v1459_v32 = vmax.f32 %v1255_v16, %v1395_v24 }
 0x21b   : > { %v1394_v31 = vmul.f32 0.2, %v1250_v28  ;;  %v1457_v35 = vmax.f32 %v1247_v20, %v1393_v27 }
 0x21c   : > { %v1460_v34 = vmax.f32 %v1258_v25, %v1396_v30 }
 0x21d   : > { %v1458_v36 = vmax.f32 %v1250_v28, %v1394_v31  ;;  %v2715_v37 = vpop.f32.mrb[72].mxu1 }
 0x21e   : > { %v1271_v38 = vadd.f32 %v2715_v37, %v3354_v55  ;;  %v1262_v39 = vpop.f32.mrb[73].mxu1  ;;  %v1504_v40 = vpack.c.bf16 %v1460_v34, %v1459_v32 }
 0x21f   : > { %v1263_v41 = vadd.f32 %v3354_v55, %v1262_v39  ;;  %v2716_v43 = vpop.f32.mrb[74].mxu1  ;;  %v1503_v44 = vpack.c.bf16 %v1458_v36, %v1457_v35 }
 0x220   : > { %v1399_v45 = vmul.f32 0.2, %v1271_v38  ;;  %v1274_v48 = vadd.f32 %v2716_v43, %v3354_v55  ;;  %v1265_v49 = vpop.f32.mrb[75].mxu1 }
 0x221   : > { %v1397_v47 = vmul.f32 0.2, %v1263_v41  ;;  %v1266_v59 = vadd.f32 %v3354_v55, %v1265_v49  ;;  %2789 = vmatprep.mubr.bf16.mxu0 %v1503_v44 }
 0x222   : > { %v1400_v29 = vmul.f32 0.2, %v1274_v48  ;;  %2790 = vmatmul.mubr.bf16.gmra.mrb[68].mxu0 %v1504_v40  ;;  %v1463_v4 = vmax.f32 %v1271_v38, %v1399_v45 }
 0x223   : > { %v1398_v33 = vmul.f32 0.2, %v1266_v59  ;;  %v1461_v42 = vmax.f32 %v1263_v41, %v1397_v47 }
 0x224   : > { %v1464_v8 = vmax.f32 %v1274_v48, %v1400_v29 }
 0x225   : > { %v1462_v46 = vmax.f32 %v1266_v59, %v1398_v33  ;;  %v2719_v19 = vpop.f32.mrb[76].mxu1 }
 0x226   : > { %v1287_v23 = vadd.f32 %v2719_v19, %v3354_v55  ;;  %v1278_v50 = vpop.f32.mrb[77].mxu1  ;;  %v1506_v51 = vpack.c.bf16 %v1464_v8, %v1463_v4 }
 0x227   : > { %v1279_v52 = vadd.f32 %v3354_v55, %v1278_v50  ;;  %v2720_v53 = vpop.f32.mrb[78].mxu1  ;;  %v1505_v54 = vpack.c.bf16 %v1462_v46, %v1461_v42 }
 0x228   : > { %v1403_v56 = vmul.f32 0.2, %v1287_v23  ;;  %v1290_v57 = vadd.f32 %v2720_v53, %v3354_v55  ;;  %v1281_v58 = vpop.f32.mrb[79].mxu1 }
 0x229   : > { %v1401_v60 = vmul.f32 0.2, %v1279_v52  ;;  %v1282_v61 = vadd.f32 %v3354_v55, %v1281_v58  ;;  %2793 = vmatprep.mubr.bf16.mxu0 %v1505_v54 }
 0x22a   : > { %v1404_v62 = vmul.f32 0.2, %v1290_v57  ;;  %2794 = vmatmul.mubr.bf16.gmra.mrb[72].mxu0 %v1506_v51  ;;  %v1467_v0 = vmax.f32 %v1287_v23, %v1403_v56 }
 0x22b   : > { %v1402_v63 = vmul.f32 0.2, %v1282_v61  ;;  %v1465_v2 = vmax.f32 %v1279_v52, %v1401_v60 }
 0x22c   : > { %v1468_v1 = vmax.f32 %v1290_v57, %v1404_v62 }
 0x22d   : > { %v1466_v3 = vmax.f32 %v1282_v61, %v1402_v63  ;;  %v2723_v5 = vpop.f32.mrb[80].mxu1 }
 0x22e   : > { %v1303_v6 = vadd.f32 %v2723_v5, %v3354_v55  ;;  %v1294_v7 = vpop.f32.mrb[81].mxu1  ;;  %v1508_v9 = vpack.c.bf16 %v1468_v1, %v1467_v0 }
 0x22f   : > { %v1295_v10 = vadd.f32 %v3354_v55, %v1294_v7  ;;  %v2724_v11 = vpop.f32.mrb[82].mxu1  ;;  %v1507_v12 = vpack.c.bf16 %v1466_v3, %v1465_v2 }
 0x230   : > { %v1407_v13 = vmul.f32 0.2, %v1303_v6  ;;  %v1306_v14 = vadd.f32 %v2724_v11, %v3354_v55  ;;  %v1297_v15 = vpop.f32.mrb[83].mxu1 }
 0x231   : > { %v1405_v16 = vmul.f32 0.2, %v1295_v10  ;;  %v1298_v17 = vadd.f32 %v3354_v55, %v1297_v15  ;;  %2797 = vmatprep.mubr.bf16.mxu0 %v1507_v12 }
 0x232   : > { %v1408_v18 = vmul.f32 0.2, %v1306_v14  ;;  %2798 = vmatmul.mubr.bf16.gmra.mrb[76].mxu0 %v1508_v9  ;;  %v1471_v21 = vmax.f32 %v1303_v6, %v1407_v13 }
 0x233   : > { %v1406_v20 = vmul.f32 0.2, %v1298_v17  ;;  %v1469_v24 = vmax.f32 %v1295_v10, %v1405_v16 }
 0x234   : > { %v1472_v22 = vmax.f32 %v1306_v14, %v1408_v18 }
 0x235   : > { %v1470_v25 = vmax.f32 %v1298_v17, %v1406_v20  ;;  %v2727_v26 = vpop.f32.mrb[84].mxu1  ;;  %v3424_v17 = vld [vmem:[%s3832_s6] ss:$0 sm:$0xff] }
 0x236   : > { %v1319_v27 = vadd.f32 %v2727_v26, %v3354_v55  ;;  %v1310_v28 = vpop.f32.mrb[85].mxu1  ;;  %v1510_v30 = vpack.c.bf16 %v1472_v22, %v1471_v21 }
 0x237   : > { %v1311_v31 = vadd.f32 %v3354_v55, %v1310_v28  ;;  %v2728_v32 = vpop.f32.mrb[86].mxu1  ;;  %v1509_v34 = vpack.c.bf16 %v1470_v25, %v1469_v24 }
 0x238   : > { %v1411_v35 = vmul.f32 0.2, %v1319_v27  ;;  %v1322_v36 = vadd.f32 %v2728_v32, %v3354_v55  ;;  %v1313_v37 = vpop.f32.mrb[87].mxu1 }
 0x239   : > { %v1409_v38 = vmul.f32 0.2, %v1311_v31  ;;  %v1314_v39 = vadd.f32 %v3354_v55, %v1313_v37  ;;  %2801 = vmatprep.mubr.bf16.mxu0 %v1509_v34 }
 0x23a   : > { %v1412_v40 = vmul.f32 0.2, %v1322_v36  ;;  %2802 = vmatmul.mubr.bf16.gmra.mrb[80].mxu0 %v1510_v30  ;;  %v1475_v43 = vmax.f32 %v1319_v27, %v1411_v35 }
 0x23b   : > { %v1410_v41 = vmul.f32 0.2, %v1314_v39  ;;  %v1473_v45 = vmax.f32 %v1311_v31, %v1409_v38 }
 0x23c   : > { %v1476_v44 = vmax.f32 %v1322_v36, %v1412_v40 }
 0x23d   : > { %v1474_v48 = vmax.f32 %v1314_v39, %v1410_v41  ;;  %v2731_v49 = vpop.f32.mrb[88].mxu1 }
 0x23e   : > { %v1335_v47 = vadd.f32 %v2731_v49, %v3354_v55  ;;  %v1326_v59 = vpop.f32.mrb[89].mxu1  ;;  %v1512_v29 = vpack.c.bf16 %v1476_v44, %v1475_v43 }
 0x23f   : > { %v1327_v33 = vadd.f32 %v3354_v55, %v1326_v59  ;;  %v2732_v4 = vpop.f32.mrb[90].mxu1  ;;  %v1511_v8 = vpack.c.bf16 %v1474_v48, %v1473_v45 }
 0x240   : > { %v1415_v42 = vmul.f32 0.2, %v1335_v47  ;;  %v1338_v46 = vadd.f32 %v2732_v4, %v3354_v55  ;;  %v1329_v19 = vpop.f32.mrb[91].mxu1 }
 0x241   : > { %v1413_v23 = vmul.f32 0.2, %v1327_v33  ;;  %v1330_v50 = vadd.f32 %v3354_v55, %v1329_v19  ;;  %2805 = vmatprep.mubr.bf16.mxu0 %v1511_v8 }
 0x242   : > { %v1416_v51 = vmul.f32 0.2, %v1338_v46  ;;  %2806 = vmatmul.mubr.bf16.gmra.mrb[84].mxu0 %v1512_v29  ;;  %v1479_v53 = vmax.f32 %v1335_v47, %v1415_v42 }
 0x243   : > { %v1414_v52 = vmul.f32 0.2, %v1330_v50  ;;  %v1477_v56 = vmax.f32 %v1327_v33, %v1413_v23 }
 0x244   : > { %v1480_v54 = vmax.f32 %v1338_v46, %v1416_v51 }
 0x245   : > { %v1478_v57 = vmax.f32 %v1330_v50, %v1414_v52  ;;  %v2735_v58 = vpop.f32.mrb[92].mxu1 }
 0x246   : > { %v1351_v60 = vadd.f32 %v2735_v58, %v3354_v55  ;;  %v1342_v61 = vpop.f32.mrb[93].mxu1  ;;  %v1514_v62 = vpack.c.bf16 %v1480_v54, %v1479_v53 }
 0x247   : > { %v1343_v63 = vadd.f32 %v3354_v55, %v1342_v61  ;;  %v2736_v0 = vpop.f32.mrb[94].mxu1  ;;  %v1513_v1 = vpack.c.bf16 %v1478_v57, %v1477_v56 }
 0x248   : > { %v1419_v2 = vmul.f32 0.2, %v1351_v60  ;;  %v1354_v3 = vadd.f32 %v2736_v0, %v3354_v55  ;;  %v1345_v5 = vpop.f32.mrb[95].mxu1 }
 0x249   : > { %v1417_v6 = vmul.f32 0.2, %v1343_v63  ;;  %v1346_v7 = vadd.f32 %v3354_v55, %v1345_v5  ;;  %2809 = vmatprep.mubr.bf16.mxu0 %v1513_v1 }
 0x24a   : > { %v1420_v9 = vmul.f32 0.2, %v1354_v3  ;;  %2810 = vmatmul.mubr.bf16.gmra.mrb[88].mxu0 %v1514_v62  ;;  %v1483_v11 = vmax.f32 %v1351_v60, %v1419_v2 }
 0x24b   : > { %v1418_v10 = vmul.f32 0.2, %v1346_v7  ;;  %v1481_v13 = vmax.f32 %v1343_v63, %v1417_v6 }
 0x24c   : > { %v1484_v12 = vmax.f32 %v1354_v3, %v1420_v9 }
 0x24d   : > { %v1482_v14 = vmax.f32 %v1346_v7, %v1418_v10 }
 0x24e   : > { %v1516_v15 = vpack.c.bf16 %v1484_v12, %v1483_v11 }
 0x24f   : > { %v1515_v16 = vpack.c.bf16 %v1482_v14, %v1481_v13 }
 0x251   : > { %2813 = vmatprep.mubr.bf16.mxu0 %v1515_v16 }
 0x252   : > { %2814 = vmatmul.mubr.bf16.gmra.mrb[92].mxu0 %v1516_v15 }
 0x2ad   : > { %v2755_v55 = vpop.f32.mrb[32].mxu0 }
 0x2ae   : > { %v1614_v18 = vadd.f32 %v2755_v55, %v3424_v17  ;;  %v1605_v20 = vpop.f32.mrb[33].mxu0 }
 0x2af   : > { %v1606_v21 = vadd.f32 %v3424_v17, %v1605_v20  ;;  %v2756_v22 = vpop.f32.mrb[34].mxu0 }
 0x2b0   : > { %1862 = vst.msk [vmem:[%s3428_s13 + $0x10] sm:$0xff] %vm461_vm2, %v1614_v18  ;;  %v1617_v24 = vadd.f32 %v2756_v22, %v3424_v17  ;;  %v1608_v25 = vpop.f32.mrb[35].mxu0 }
 0x2b1   : > { %1860 = vst.msk [vmem:[%s3428_s13] sm:$0xff] %vm461_vm2, %v1606_v21  ;;  %v1609_v26 = vadd.f32 %v3424_v17, %v1608_v25 }
 0x2b2   : > { %1863 = vst.msk [vmem:[%s3428_s13 + $0x18] sm:$0xff] %vm461_vm2, %v1617_v24 }
 0x2b3   : > { %1861 = vst.msk [vmem:[%s3428_s13 + $0x8] sm:$0xff] %vm461_vm2, %v1609_v26 }
 0x2b5   : > { %v2759_v27 = vpop.f32.mrb[36].mxu0 }
 0x2b6   : > { %v1630_v28 = vadd.f32 %v2759_v27, %v3424_v17  ;;  %v1621_v30 = vpop.f32.mrb[37].mxu0 }
 0x2b7   : > { %v1622_v31 = vadd.f32 %v3424_v17, %v1621_v30  ;;  %v2760_v32 = vpop.f32.mrb[38].mxu0 }
 0x2b8   : > { %1866 = vst.msk [vmem:[%s3428_s13 + $0x30] sm:$0xff] %vm461_vm2, %v1630_v28  ;;  %v1633_v34 = vadd.f32 %v2760_v32, %v3424_v17  ;;  %v1624_v35 = vpop.f32.mrb[39].mxu0 }
 0x2b9   : > { %1864 = vst.msk [vmem:[%s3428_s13 + $0x20] sm:$0xff] %vm461_vm2, %v1622_v31  ;;  %v1625_v36 = vadd.f32 %v3424_v17, %v1624_v35 }
 0x2ba   : > { %1867 = vst.msk [vmem:[%s3428_s13 + $0x38] sm:$0xff] %vm461_vm2, %v1633_v34 }
 0x2bb   : > { %1865 = vst.msk [vmem:[%s3428_s13 + $0x28] sm:$0xff] %vm461_vm2, %v1625_v36 }
 0x2bd   : > { %v2763_v37 = vpop.f32.mrb[40].mxu0 }
 0x2be   : > { %v1646_v38 = vadd.f32 %v2763_v37, %v3424_v17  ;;  %v1637_v39 = vpop.f32.mrb[41].mxu0 }
 0x2bf   : > { %v1638_v40 = vadd.f32 %v3424_v17, %v1637_v39  ;;  %v2764_v41 = vpop.f32.mrb[42].mxu0 }
 0x2c0   : > { %1870 = vst.msk [vmem:[%s3428_s13 + $0x50] sm:$0xff] %vm461_vm2, %v1646_v38  ;;  %v1649_v43 = vadd.f32 %v2764_v41, %v3424_v17  ;;  %v1640_v44 = vpop.f32.mrb[43].mxu0 }
 0x2c1   : > { %1868 = vst.msk [vmem:[%s3428_s13 + $0x40] sm:$0xff] %vm461_vm2, %v1638_v40  ;;  %v1641_v45 = vadd.f32 %v3424_v17, %v1640_v44 }
 0x2c2   : > { %1871 = vst.msk [vmem:[%s3428_s13 + $0x58] sm:$0xff] %vm461_vm2, %v1649_v43 }
 0x2c3   : > { %1869 = vst.msk [vmem:[%s3428_s13 + $0x48] sm:$0xff] %vm461_vm2, %v1641_v45 }
 0x2c5   : > { %v2767_v48 = vpop.f32.mrb[44].mxu0 }
 0x2c6   : > { %v1662_v49 = vadd.f32 %v2767_v48, %v3424_v17  ;;  %v1653_v47 = vpop.f32.mrb[45].mxu0 }
 0x2c7   : > { %v1654_v59 = vadd.f32 %v3424_v17, %v1653_v47  ;;  %v2768_v29 = vpop.f32.mrb[46].mxu0 }
 0x2c8   : > { %1874 = vst.msk [vmem:[%s3428_s13 + $0x70] sm:$0xff] %vm461_vm2, %v1662_v49  ;;  %v1665_v33 = vadd.f32 %v2768_v29, %v3424_v17  ;;  %v1656_v4 = vpop.f32.mrb[47].mxu0 }
 0x2c9   : > { %1872 = vst.msk [vmem:[%s3428_s13 + $0x60] sm:$0xff] %vm461_vm2, %v1654_v59  ;;  %v1657_v8 = vadd.f32 %v3424_v17, %v1656_v4 }
 0x2ca   : > { %1875 = vst.msk [vmem:[%s3428_s13 + $0x78] sm:$0xff] %vm461_vm2, %v1665_v33 }
 0x2cb   : > { %1873 = vst.msk [vmem:[%s3428_s13 + $0x68] sm:$0xff] %vm461_vm2, %v1657_v8 }
 0x2cd   : > { %v2771_v42 = vpop.f32.mrb[48].mxu0 }
 0x2ce   : > { %v1678_v46 = vadd.f32 %v2771_v42, %v3424_v17  ;;  %v1669_v19 = vpop.f32.mrb[49].mxu0 }
 0x2cf   : > { %v1670_v23 = vadd.f32 %v3424_v17, %v1669_v19  ;;  %v2772_v50 = vpop.f32.mrb[50].mxu0 }
 0x2d0   : > { %1878 = vst.msk [vmem:[%s3428_s13 + $0x90] sm:$0xff] %vm461_vm2, %v1678_v46  ;;  %v1681_v51 = vadd.f32 %v2772_v50, %v3424_v17  ;;  %v1672_v52 = vpop.f32.mrb[51].mxu0 }
 0x2d1   : > { %1876 = vst.msk [vmem:[%s3428_s13 + $0x80] sm:$0xff] %vm461_vm2, %v1670_v23  ;;  %v1673_v53 = vadd.f32 %v3424_v17, %v1672_v52 }
 0x2d2   : > { %1879 = vst.msk [vmem:[%s3428_s13 + $0x98] sm:$0xff] %vm461_vm2, %v1681_v51 }
 0x2d3   : > { %1877 = vst.msk [vmem:[%s3428_s13 + $0x88] sm:$0xff] %vm461_vm2, %v1673_v53 }
 0x2d5   : > { %v2775_v54 = vpop.f32.mrb[52].mxu0 }
 0x2d6   : > { %v1694_v56 = vadd.f32 %v2775_v54, %v3424_v17  ;;  %v1685_v57 = vpop.f32.mrb[53].mxu0 }
 0x2d7   : > { %v1686_v58 = vadd.f32 %v3424_v17, %v1685_v57  ;;  %v2776_v60 = vpop.f32.mrb[54].mxu0 }
 0x2d8   : > { %1882 = vst.msk [vmem:[%s3428_s13 + $0xb0] sm:$0xff] %vm461_vm2, %v1694_v56  ;;  %v1697_v61 = vadd.f32 %v2776_v60, %v3424_v17  ;;  %v1688_v62 = vpop.f32.mrb[55].mxu0 }
 0x2d9   : > { %1880 = vst.msk [vmem:[%s3428_s13 + $0xa0] sm:$0xff] %vm461_vm2, %v1686_v58  ;;  %v1689_v63 = vadd.f32 %v3424_v17, %v1688_v62 }
 0x2da   : > { %1883 = vst.msk [vmem:[%s3428_s13 + $0xb8] sm:$0xff] %vm461_vm2, %v1697_v61 }
 0x2db   : > { %1881 = vst.msk [vmem:[%s3428_s13 + $0xa8] sm:$0xff] %vm461_vm2, %v1689_v63 }
 0x2dd   : > { %v2779_v0 = vpop.f32.mrb[56].mxu0 }
 0x2de   : > { %v1710_v1 = vadd.f32 %v2779_v0, %v3424_v17  ;;  %v1701_v2 = vpop.f32.mrb[57].mxu0 }
 0x2df   : > { %v1702_v3 = vadd.f32 %v3424_v17, %v1701_v2  ;;  %v2780_v5 = vpop.f32.mrb[58].mxu0 }
 0x2e0   : > { %1886 = vst.msk [vmem:[%s3428_s13 + $0xd0] sm:$0xff] %vm461_vm2, %v1710_v1  ;;  %v1713_v6 = vadd.f32 %v2780_v5, %v3424_v17  ;;  %v1704_v7 = vpop.f32.mrb[59].mxu0 }
 0x2e1   : > { %1884 = vst.msk [vmem:[%s3428_s13 + $0xc0] sm:$0xff] %vm461_vm2, %v1702_v3  ;;  %v1705_v9 = vadd.f32 %v3424_v17, %v1704_v7 }
 0x2e2   : > { %1887 = vst.msk [vmem:[%s3428_s13 + $0xd8] sm:$0xff] %vm461_vm2, %v1713_v6 }
 0x2e3   : > { %1885 = vst.msk [vmem:[%s3428_s13 + $0xc8] sm:$0xff] %vm461_vm2, %v1705_v9 }
 0x2e5   : > { %v2783_v10 = vpop.f32.mrb[60].mxu0 }
 0x2e6   : > { %v1726_v11 = vadd.f32 %v2783_v10, %v3424_v17  ;;  %v1717_v12 = vpop.f32.mrb[61].mxu0 }
 0x2e7   : > { %v1718_v13 = vadd.f32 %v3424_v17, %v1717_v12  ;;  %v2784_v14 = vpop.f32.mrb[62].mxu0 }
 0x2e8   : > { %1890 = vst.msk [vmem:[%s3428_s13 + $0xf0] sm:$0xff] %vm461_vm2, %v1726_v11  ;;  %v1729_v15 = vadd.f32 %v2784_v14, %v3424_v17  ;;  %v1720_v16 = vpop.f32.mrb[63].mxu0 }
 0x2e9   : > { %1888 = vst.msk [vmem:[%s3428_s13 + $0xe0] sm:$0xff] %vm461_vm2, %v1718_v13  ;;  %v1721_v55 = vadd.f32 %v3424_v17, %v1720_v16 }
 0x2ea   : > { %1891 = vst.msk [vmem:[%s3428_s13 + $0xf8] sm:$0xff] %vm461_vm2, %v1729_v15 }
 0x2eb   : > { %1889 = vst.msk [vmem:[%s3428_s13 + $0xe8] sm:$0xff] %vm461_vm2, %v1721_v55 }
 0x2ed   : > { %v2787_v18 = vpop.f32.mrb[64].mxu0 }
 0x2ee   : > { %v1742_v20 = vadd.f32 %v2787_v18, %v3424_v17  ;;  %v1733_v21 = vpop.f32.mrb[65].mxu0 }
 0x2ef   : > { %v1734_v22 = vadd.f32 %v3424_v17, %v1733_v21  ;;  %v2788_v24 = vpop.f32.mrb[66].mxu0 }
 0x2f0   : > { %1894 = vst.msk [vmem:[%s3428_s13 + $0x110] sm:$0xff] %vm461_vm2, %v1742_v20  ;;  %v1745_v25 = vadd.f32 %v2788_v24, %v3424_v17  ;;  %v1736_v26 = vpop.f32.mrb[67].mxu0 }
 0x2f1   : > { %1892 = vst.msk [vmem:[%s3428_s13 + $0x100] sm:$0xff] %vm461_vm2, %v1734_v22  ;;  %v1737_v27 = vadd.f32 %v3424_v17, %v1736_v26 }
 0x2f2   : > { %1895 = vst.msk [vmem:[%s3428_s13 + $0x118] sm:$0xff] %vm461_vm2, %v1745_v25 }
 0x2f3   : > { %1893 = vst.msk [vmem:[%s3428_s13 + $0x108] sm:$0xff] %vm461_vm2, %v1737_v27 }
 0x2f5   : > { %v2791_v28 = vpop.f32.mrb[68].mxu0 }
 0x2f6   : > { %v1758_v30 = vadd.f32 %v2791_v28, %v3424_v17  ;;  %v1749_v31 = vpop.f32.mrb[69].mxu0 }
 0x2f7   : > { %v1750_v32 = vadd.f32 %v3424_v17, %v1749_v31  ;;  %v2792_v34 = vpop.f32.mrb[70].mxu0 }
 0x2f8   : > { %1898 = vst.msk [vmem:[%s3428_s13 + $0x130] sm:$0xff] %vm461_vm2, %v1758_v30  ;;  %v1761_v35 = vadd.f32 %v2792_v34, %v3424_v17  ;;  %v1752_v36 = vpop.f32.mrb[71].mxu0 }
 0x2f9   : > { %1896 = vst.msk [vmem:[%s3428_s13 + $0x120] sm:$0xff] %vm461_vm2, %v1750_v32  ;;  %v1753_v37 = vadd.f32 %v3424_v17, %v1752_v36 }
 0x2fa   : > { %1899 = vst.msk [vmem:[%s3428_s13 + $0x138] sm:$0xff] %vm461_vm2, %v1761_v35 }
 0x2fb   : > { %1897 = vst.msk [vmem:[%s3428_s13 + $0x128] sm:$0xff] %vm461_vm2, %v1753_v37 }
 0x2fd   : > { %v2795_v38 = vpop.f32.mrb[72].mxu0 }
 0x2fe   : > { %v1774_v39 = vadd.f32 %v2795_v38, %v3424_v17  ;;  %v1765_v40 = vpop.f32.mrb[73].mxu0 }
 0x2ff   : > { %v1766_v41 = vadd.f32 %v3424_v17, %v1765_v40  ;;  %v2796_v43 = vpop.f32.mrb[74].mxu0 }
 0x300   : > { %1902 = vst.msk [vmem:[%s3428_s13 + $0x150] sm:$0xff] %vm461_vm2, %v1774_v39  ;;  %v1777_v44 = vadd.f32 %v2796_v43, %v3424_v17  ;;  %v1768_v45 = vpop.f32.mrb[75].mxu0 }
 0x301   : > { %1900 = vst.msk [vmem:[%s3428_s13 + $0x140] sm:$0xff] %vm461_vm2, %v1766_v41  ;;  %v1769_v48 = vadd.f32 %v3424_v17, %v1768_v45 }
 0x302   : > { %1903 = vst.msk [vmem:[%s3428_s13 + $0x158] sm:$0xff] %vm461_vm2, %v1777_v44 }
 0x303   : > { %1901 = vst.msk [vmem:[%s3428_s13 + $0x148] sm:$0xff] %vm461_vm2, %v1769_v48 }
 0x305   : > { %v2799_v49 = vpop.f32.mrb[76].mxu0 }
 0x306   : > { %v1790_v47 = vadd.f32 %v2799_v49, %v3424_v17  ;;  %v1781_v59 = vpop.f32.mrb[77].mxu0 }
 0x307   : > { %v1782_v29 = vadd.f32 %v3424_v17, %v1781_v59  ;;  %v2800_v33 = vpop.f32.mrb[78].mxu0 }
 0x308   : > { %1906 = vst.msk [vmem:[%s3428_s13 + $0x170] sm:$0xff] %vm461_vm2, %v1790_v47  ;;  %v1793_v4 = vadd.f32 %v2800_v33, %v3424_v17  ;;  %v1784_v8 = vpop.f32.mrb[79].mxu0 }
 0x309   : > { %1904 = vst.msk [vmem:[%s3428_s13 + $0x160] sm:$0xff] %vm461_vm2, %v1782_v29  ;;  %v1785_v42 = vadd.f32 %v3424_v17, %v1784_v8 }
 0x30a   : > { %1907 = vst.msk [vmem:[%s3428_s13 + $0x178] sm:$0xff] %vm461_vm2, %v1793_v4 }
 0x30b   : > { %1905 = vst.msk [vmem:[%s3428_s13 + $0x168] sm:$0xff] %vm461_vm2, %v1785_v42 }
 0x30d   : > { %v2803_v46 = vpop.f32.mrb[80].mxu0 }
 0x30e   : > { %v1806_v19 = vadd.f32 %v2803_v46, %v3424_v17  ;;  %v1797_v23 = vpop.f32.mrb[81].mxu0 }
 0x30f   : > { %v1798_v50 = vadd.f32 %v3424_v17, %v1797_v23  ;;  %v2804_v51 = vpop.f32.mrb[82].mxu0 }
 0x310   : > { %1910 = vst.msk [vmem:[%s3428_s13 + $0x190] sm:$0xff] %vm461_vm2, %v1806_v19  ;;  %v1809_v52 = vadd.f32 %v2804_v51, %v3424_v17  ;;  %v1800_v53 = vpop.f32.mrb[83].mxu0 }
 0x311   : > { %1908 = vst.msk [vmem:[%s3428_s13 + $0x180] sm:$0xff] %vm461_vm2, %v1798_v50  ;;  %v1801_v54 = vadd.f32 %v3424_v17, %v1800_v53 }
 0x312   : > { %1911 = vst.msk [vmem:[%s3428_s13 + $0x198] sm:$0xff] %vm461_vm2, %v1809_v52 }
 0x313   : > { %1909 = vst.msk [vmem:[%s3428_s13 + $0x188] sm:$0xff] %vm461_vm2, %v1801_v54 }
 0x315   : > { %v2807_v56 = vpop.f32.mrb[84].mxu0 }
 0x316   : > { %v1822_v57 = vadd.f32 %v2807_v56, %v3424_v17  ;;  %v1813_v58 = vpop.f32.mrb[85].mxu0 }
 0x317   : > { %v1814_v60 = vadd.f32 %v3424_v17, %v1813_v58  ;;  %v2808_v61 = vpop.f32.mrb[86].mxu0 }
 0x318   : > { %1914 = vst.msk [vmem:[%s3428_s13 + $0x1b0] sm:$0xff] %vm461_vm2, %v1822_v57  ;;  %v1825_v62 = vadd.f32 %v2808_v61, %v3424_v17  ;;  %v1816_v63 = vpop.f32.mrb[87].mxu0 }
 0x319   : > { %1912 = vst.msk [vmem:[%s3428_s13 + $0x1a0] sm:$0xff] %vm461_vm2, %v1814_v60  ;;  %v1817_v0 = vadd.f32 %v3424_v17, %v1816_v63 }
 0x31a   : > { %1915 = vst.msk [vmem:[%s3428_s13 + $0x1b8] sm:$0xff] %vm461_vm2, %v1825_v62 }
 0x31b   : > { %1913 = vst.msk [vmem:[%s3428_s13 + $0x1a8] sm:$0xff] %vm461_vm2, %v1817_v0 }
 0x31d   : > { %v2811_v1 = vpop.f32.mrb[88].mxu0 }
 0x31e   : > { %v1838_v2 = vadd.f32 %v2811_v1, %v3424_v17  ;;  %v1829_v3 = vpop.f32.mrb[89].mxu0 }
 0x31f   : > { %v1830_v5 = vadd.f32 %v3424_v17, %v1829_v3  ;;  %v2812_v6 = vpop.f32.mrb[90].mxu0 }
 0x320   : > { %1918 = vst.msk [vmem:[%s3428_s13 + $0x1d0] sm:$0xff] %vm461_vm2, %v1838_v2  ;;  %v1841_v7 = vadd.f32 %v2812_v6, %v3424_v17  ;;  %v1832_v9 = vpop.f32.mrb[91].mxu0 }
 0x321   : > { %1916 = vst.msk [vmem:[%s3428_s13 + $0x1c0] sm:$0xff] %vm461_vm2, %v1830_v5  ;;  %v1833_v10 = vadd.f32 %v3424_v17, %v1832_v9 }
 0x322   : > { %1919 = vst.msk [vmem:[%s3428_s13 + $0x1d8] sm:$0xff] %vm461_vm2, %v1841_v7 }
 0x323   : > { %1917 = vst.msk [vmem:[%s3428_s13 + $0x1c8] sm:$0xff] %vm461_vm2, %v1833_v10 }
 0x325   : > { %v2815_v11 = vpop.f32.mrb[92].mxu0  ;;  %1930 = sbr.rel (!%p3085_p4) target bundleno = 884 (0x374), region = 52 }
 0x326   : > { %v1854_v12 = vadd.f32 %v2815_v11, %v3424_v17  ;;  %v1845_v13 = vpop.f32.mrb[93].mxu0 }
 0x327   : > { %v1846_v14 = vadd.f32 %v3424_v17, %v1845_v13  ;;  %v2816_v15 = vpop.f32.mrb[94].mxu0 }
 0x328   : > { %1922 = vst.msk [vmem:[%s3428_s13 + $0x1f0] sm:$0xff] %vm461_vm2, %v1854_v12  ;;  %v1857_v16 = vadd.f32 %v2816_v15, %v3424_v17  ;;  %v1848_v55 = vpop.f32.mrb[95].mxu0 }
 0x329   : > { %1920 = vst.msk [vmem:[%s3428_s13 + $0x1e0] sm:$0xff] %vm461_vm2, %v1846_v14  ;;  %v1849_v18 = vadd.f32 %v3424_v17, %v1848_v55 }
 0x32a   : > { %1923 = vst.msk [vmem:[%s3428_s13 + $0x1f8] sm:$0xff] %vm461_vm2, %v1857_v16 }
 0x32b   : > { %1921 = vst.msk [vmem:[%s3428_s13 + $0x1e8] sm:$0xff] %vm461_vm2, %v1849_v18 }
 0x32c   : > { %s3844_s24 = smov (!%p1933_p8, %s1932_s24), 64 }
 0x32d   : > { %s2454_s19 = sshll.u32 %s3844_s24, 7 }
 0x32e   : > { %p2457_p9 = scmp.eq.s32.totalorder %s2454_s19, 0 }
 0x32f   : > { %s3633_s20 = sshrl.u32 (!%p2457_p9), %s3844_s24, 6 }
 0x330   : > { %1941 = sbr.rel (%p2457_p9) target bundleno = 884 (0x374), region = 56  ;;  %p2458_p10 = scmp.le.s32.totalorder (!%p2457_p9), %s3633_s20, 0 }
 0x337   : > { %2347 = sbr.rel (%p2458_p10) target bundleno = 863 (0x35f), region = 132  ;;  %s3835_s27 = smov (!%p2458_p10), %s3627_s18 }
 0x338   : > { %s3836_s9 = smov (!%p2458_p10), %s3428_s13  ;;  %s3642_s16 = smov (!%p2458_p10), 0  }
 0x339   : > { %s3644_s21 = smov (!%p2458_p10), 0  }
 0x33e LB: >> { %v2129_v17 = vld [vmem:[%s2993_s9] sm:$0xff]  ;;  %v2131_v20 = vld [vmem:[%s2993_s9 + $0x8] sm:$0xff]  ;;  %v2133_v21 = vld [vmem:[%s2993_s9 + $0x10] sm:$0xff]  ;;  %s2257_s22 = sadd.s32 1, %s2997_s16  ;;  %s2123_s21 = sadd.s32 1, %s3001_s21   ;;  %s3001_s21 = sphi %s3644_s21, %s2123_s21   ;;  %s2997_s16 = sphi %s3642_s16, %s3839_s16   ;;  %s2993_s9 = sphi %s3836_s9, %s3838_s9   ;;  %s2989_s27 = sphi %s3835_s27, %s3837_s27  }
 0x33f   : >> { %2130 = vst [vmem:[%s2989_s27] sm:$0xff] %v2129_v17  ;;  %2132 = vst [vmem:[%s2989_s27 + $0x8] sm:$0xff] %v2131_v20  ;;  %v2135_v22 = vld [vmem:[%s2993_s9 + $0x18] sm:$0xff]  ;;  %v2137_v24 = vld [vmem:[%s2993_s9 + $0x20] sm:$0xff]  ;;  %p2258_p11 = scmp.ge.s32.totalorder %s2257_s22, %s3633_s20  ;;  %p2122_p12 = scmp.ge.s32.totalorder %s2123_s21, %s3633_s20 }
 0x340   : >> { %2134 = vst [vmem:[%s2989_s27 + $0x10] sm:$0xff] %v2133_v21  ;;  %v2139_v25 = vld [vmem:[%s2993_s9 + $0x28] sm:$0xff]  ;;  %2136 = vst [vmem:[%s2989_s27 + $0x18] sm:$0xff] %v2135_v22  ;;  %v2141_v26 = vld [vmem:[%s2993_s9 + $0x30] sm:$0xff] }
 0x341   : >> { %2138 = vst [vmem:[%s2989_s27 + $0x20] sm:$0xff] %v2137_v24  ;;  %2140 = vst [vmem:[%s2989_s27 + $0x28] sm:$0xff] %v2139_v25  ;;  %v2143_v27 = vld [vmem:[%s2993_s9 + $0x38] sm:$0xff]  ;;  %v2145_v28 = vld [vmem:[%s2993_s9 + $0x40] sm:$0xff]  ;;  %s3846_s22 = smov (%p2258_p11, %s2257_s22), 0 }
 0x342   : >> { %2142 = vst [vmem:[%s2989_s27 + $0x30] sm:$0xff] %v2141_v26  ;;  %2144 = vst [vmem:[%s2989_s27 + $0x38] sm:$0xff] %v2143_v27  ;;  %v2147_v30 = vld [vmem:[%s2993_s9 + $0x48] sm:$0xff]  ;;  %v2149_v31 = vld [vmem:[%s2993_s9 + $0x50] sm:$0xff]  ;;  %s2459_s26 = sshll.u32 %s3846_s22, 9  ;;  %s3839_s16 = smov %s3846_s22 }
 0x343   : >> { %2146 = vst [vmem:[%s2989_s27 + $0x40] sm:$0xff] %v2145_v28  ;;  %v2151_v32 = vld [vmem:[%s2993_s9 + $0x58] sm:$0xff]  ;;  %2148 = vst [vmem:[%s2989_s27 + $0x48] sm:$0xff] %v2147_v30  ;;  %v2153_v34 = vld [vmem:[%s2993_s9 + $0x60] sm:$0xff]  ;;  %s3700_s23 = scalar_lea.vmem %s3428_s13, %s2459_s26 [#allocation2]   ;;  %s3703_s29 = scalar_lea.vmem %s3627_s18, %s2459_s26  }
 0x344   : >> { %2150 = vst [vmem:[%s2989_s27 + $0x50] sm:$0xff] %v2149_v31  ;;  %2152 = vst [vmem:[%s2989_s27 + $0x58] sm:$0xff] %v2151_v32  ;;  %v2155_v35 = vld [vmem:[%s2993_s9 + $0x68] sm:$0xff]  ;;  %v2157_v36 = vld [vmem:[%s2993_s9 + $0x70] sm:$0xff] }
 0x345   : >> { %2154 = vst [vmem:[%s2989_s27 + $0x60] sm:$0xff] %v2153_v34  ;;  %2156 = vst [vmem:[%s2989_s27 + $0x68] sm:$0xff] %v2155_v35  ;;  %v2159_v37 = vld [vmem:[%s2993_s9 + $0x78] sm:$0xff]  ;;  %v2161_v38 = vld [vmem:[%s2993_s9 + $0x80] sm:$0xff] }
 0x346   : >> { %2158 = vst [vmem:[%s2989_s27 + $0x70] sm:$0xff] %v2157_v36  ;;  %v2163_v39 = vld [vmem:[%s2993_s9 + $0x88] sm:$0xff]  ;;  %2160 = vst [vmem:[%s2989_s27 + $0x78] sm:$0xff] %v2159_v37  ;;  %v2165_v40 = vld [vmem:[%s2993_s9 + $0x90] sm:$0xff] }
 0x347   : >> { %2162 = vst [vmem:[%s2989_s27 + $0x80] sm:$0xff] %v2161_v38  ;;  %2164 = vst [vmem:[%s2989_s27 + $0x88] sm:$0xff] %v2163_v39  ;;  %v2167_v41 = vld [vmem:[%s2993_s9 + $0x98] sm:$0xff]  ;;  %v2169_v43 = vld [vmem:[%s2993_s9 + $0xa0] sm:$0xff] }
 0x348   : >> { %2166 = vst [vmem:[%s2989_s27 + $0x90] sm:$0xff] %v2165_v40  ;;  %2168 = vst [vmem:[%s2989_s27 + $0x98] sm:$0xff] %v2167_v41  ;;  %v2171_v44 = vld [vmem:[%s2993_s9 + $0xa8] sm:$0xff]  ;;  %v2173_v45 = vld [vmem:[%s2993_s9 + $0xb0] sm:$0xff] }
 0x349   : >> { %2170 = vst [vmem:[%s2989_s27 + $0xa0] sm:$0xff] %v2169_v43  ;;  %v2175_v48 = vld [vmem:[%s2993_s9 + $0xb8] sm:$0xff]  ;;  %2172 = vst [vmem:[%s2989_s27 + $0xa8] sm:$0xff] %v2171_v44  ;;  %v2177_v49 = vld [vmem:[%s2993_s9 + $0xc0] sm:$0xff] }
 0x34a   : >> { %2174 = vst [vmem:[%s2989_s27 + $0xb0] sm:$0xff] %v2173_v45  ;;  %2176 = vst [vmem:[%s2989_s27 + $0xb8] sm:$0xff] %v2175_v48  ;;  %v2179_v47 = vld [vmem:[%s2993_s9 + $0xc8] sm:$0xff]  ;;  %v2181_v59 = vld [vmem:[%s2993_s9 + $0xd0] sm:$0xff] }
 0x34b   : >> { %2178 = vst [vmem:[%s2989_s27 + $0xc0] sm:$0xff] %v2177_v49  ;;  %2180 = vst [vmem:[%s2989_s27 + $0xc8] sm:$0xff] %v2179_v47  ;;  %v2183_v29 = vld [vmem:[%s2993_s9 + $0xd8] sm:$0xff]  ;;  %v2185_v33 = vld [vmem:[%s2993_s9 + $0xe0] sm:$0xff] }
 0x34c   : >> { %2182 = vst [vmem:[%s2989_s27 + $0xd0] sm:$0xff] %v2181_v59  ;;  %v2187_v4 = vld [vmem:[%s2993_s9 + $0xe8] sm:$0xff]  ;;  %2184 = vst [vmem:[%s2989_s27 + $0xd8] sm:$0xff] %v2183_v29  ;;  %v2189_v8 = vld [vmem:[%s2993_s9 + $0xf0] sm:$0xff] }
 0x34d   : >> { %2186 = vst [vmem:[%s2989_s27 + $0xe0] sm:$0xff] %v2185_v33  ;;  %2188 = vst [vmem:[%s2989_s27 + $0xe8] sm:$0xff] %v2187_v4  ;;  %v2191_v42 = vld [vmem:[%s2993_s9 + $0xf8] sm:$0xff]  ;;  %v2193_v46 = vld [vmem:[%s2993_s9 + $0x100] sm:$0xff] }
 0x34e   : >> { %2190 = vst [vmem:[%s2989_s27 + $0xf0] sm:$0xff] %v2189_v8  ;;  %2192 = vst [vmem:[%s2989_s27 + $0xf8] sm:$0xff] %v2191_v42  ;;  %v2195_v19 = vld [vmem:[%s2993_s9 + $0x108] sm:$0xff]  ;;  %v2197_v23 = vld [vmem:[%s2993_s9 + $0x110] sm:$0xff] }
 0x34f   : >> { %2194 = vst [vmem:[%s2989_s27 + $0x100] sm:$0xff] %v2193_v46  ;;  %v2199_v50 = vld [vmem:[%s2993_s9 + $0x118] sm:$0xff]  ;;  %2196 = vst [vmem:[%s2989_s27 + $0x108] sm:$0xff] %v2195_v19  ;;  %v2201_v51 = vld [vmem:[%s2993_s9 + $0x120] sm:$0xff] }
 0x350   : >> { %2198 = vst [vmem:[%s2989_s27 + $0x110] sm:$0xff] %v2197_v23  ;;  %2200 = vst [vmem:[%s2989_s27 + $0x118] sm:$0xff] %v2199_v50  ;;  %v2203_v52 = vld [vmem:[%s2993_s9 + $0x128] sm:$0xff]  ;;  %v2205_v53 = vld [vmem:[%s2993_s9 + $0x130] sm:$0xff] }
 0x351   : >> { %2202 = vst [vmem:[%s2989_s27 + $0x120] sm:$0xff] %v2201_v51  ;;  %2204 = vst [vmem:[%s2989_s27 + $0x128] sm:$0xff] %v2203_v52  ;;  %v2207_v54 = vld [vmem:[%s2993_s9 + $0x138] sm:$0xff]  ;;  %v2209_v56 = vld [vmem:[%s2993_s9 + $0x140] sm:$0xff] }
 0x352   : >> { %2206 = vst [vmem:[%s2989_s27 + $0x130] sm:$0xff] %v2205_v53  ;;  %v2211_v57 = vld [vmem:[%s2993_s9 + $0x148] sm:$0xff]  ;;  %2208 = vst [vmem:[%s2989_s27 + $0x138] sm:$0xff] %v2207_v54  ;;  %v2213_v58 = vld [vmem:[%s2993_s9 + $0x150] sm:$0xff] }
 0x353   : >> { %2210 = vst [vmem:[%s2989_s27 + $0x140] sm:$0xff] %v2209_v56  ;;  %2212 = vst [vmem:[%s2989_s27 + $0x148] sm:$0xff] %v2211_v57  ;;  %v2215_v60 = vld [vmem:[%s2993_s9 + $0x158] sm:$0xff]  ;;  %v2217_v61 = vld [vmem:[%s2993_s9 + $0x160] sm:$0xff] }
 0x354   : >> { %2214 = vst [vmem:[%s2989_s27 + $0x150] sm:$0xff] %v2213_v58  ;;  %2216 = vst [vmem:[%s2989_s27 + $0x158] sm:$0xff] %v2215_v60  ;;  %v2219_v62 = vld [vmem:[%s2993_s9 + $0x168] sm:$0xff]  ;;  %v2221_v63 = vld [vmem:[%s2993_s9 + $0x170] sm:$0xff] }
 0x355   : >> { %2218 = vst [vmem:[%s2989_s27 + $0x160] sm:$0xff] %v2217_v61  ;;  %v2223_v0 = vld [vmem:[%s2993_s9 + $0x178] sm:$0xff]  ;;  %2220 = vst [vmem:[%s2989_s27 + $0x168] sm:$0xff] %v2219_v62  ;;  %v2225_v1 = vld [vmem:[%s2993_s9 + $0x180] sm:$0xff] }
 0x356   : >> { %2222 = vst [vmem:[%s2989_s27 + $0x170] sm:$0xff] %v2221_v63  ;;  %2224 = vst [vmem:[%s2989_s27 + $0x178] sm:$0xff] %v2223_v0  ;;  %v2227_v2 = vld [vmem:[%s2993_s9 + $0x188] sm:$0xff]  ;;  %v2229_v3 = vld [vmem:[%s2993_s9 + $0x190] sm:$0xff] }
 0x357   : >> { %2226 = vst [vmem:[%s2989_s27 + $0x180] sm:$0xff] %v2225_v1  ;;  %2228 = vst [vmem:[%s2989_s27 + $0x188] sm:$0xff] %v2227_v2  ;;  %v2231_v5 = vld [vmem:[%s2993_s9 + $0x198] sm:$0xff]  ;;  %v2233_v6 = vld [vmem:[%s2993_s9 + $0x1a0] sm:$0xff] }
 0x358   : >> { %2230 = vst [vmem:[%s2989_s27 + $0x190] sm:$0xff] %v2229_v3  ;;  %v2235_v7 = vld [vmem:[%s2993_s9 + $0x1a8] sm:$0xff]  ;;  %2232 = vst [vmem:[%s2989_s27 + $0x198] sm:$0xff] %v2231_v5  ;;  %v2237_v9 = vld [vmem:[%s2993_s9 + $0x1b0] sm:$0xff]  ;;  %2125 = sbr.rel (!%p2122_p12) target bundleno = 830 (0x33e), region = 138 }
 0x359   : >> { %2234 = vst [vmem:[%s2989_s27 + $0x1a0] sm:$0xff] %v2233_v6  ;;  %2236 = vst [vmem:[%s2989_s27 + $0x1a8] sm:$0xff] %v2235_v7  ;;  %v2239_v10 = vld [vmem:[%s2993_s9 + $0x1b8] sm:$0xff]  ;;  %v2241_v11 = vld [vmem:[%s2993_s9 + $0x1c0] sm:$0xff] }
 0x35a   : >> { %2238 = vst [vmem:[%s2989_s27 + $0x1b0] sm:$0xff] %v2237_v9  ;;  %2240 = vst [vmem:[%s2989_s27 + $0x1b8] sm:$0xff] %v2239_v10  ;;  %v2243_v12 = vld [vmem:[%s2993_s9 + $0x1c8] sm:$0xff]  ;;  %v2245_v13 = vld [vmem:[%s2993_s9 + $0x1d0] sm:$0xff] }
 0x35b   : >> { %2242 = vst [vmem:[%s2989_s27 + $0x1c0] sm:$0xff] %v2241_v11  ;;  %v2247_v14 = vld [vmem:[%s2993_s9 + $0x1d8] sm:$0xff]  ;;  %2244 = vst [vmem:[%s2989_s27 + $0x1c8] sm:$0xff] %v2243_v12  ;;  %v2249_v15 = vld [vmem:[%s2993_s9 + $0x1e0] sm:$0xff] }
 0x35c   : >> { %2246 = vst [vmem:[%s2989_s27 + $0x1d0] sm:$0xff] %v2245_v13  ;;  %2248 = vst [vmem:[%s2989_s27 + $0x1d8] sm:$0xff] %v2247_v14  ;;  %v2251_v16 = vld [vmem:[%s2993_s9 + $0x1e8] sm:$0xff]  ;;  %v2253_v55 = vld [vmem:[%s2993_s9 + $0x1f0] sm:$0xff] }
 0x35d   : >> { %2250 = vst [vmem:[%s2989_s27 + $0x1e0] sm:$0xff] %v2249_v15  ;;  %2252 = vst [vmem:[%s2989_s27 + $0x1e8] sm:$0xff] %v2251_v16  ;;  %v2255_v18 = vld [vmem:[%s2993_s9 + $0x1f8] sm:$0xff]  ;;  %s3838_s9 = smov %s3700_s23 }
 0x35e   : >> { %2254 = vst [vmem:[%s2989_s27 + $0x1f0] sm:$0xff] %v2253_v55  ;;  %2256 = vst [vmem:[%s2989_s27 + $0x1f8] sm:$0xff] %v2255_v18  ;;  %s3837_s27 = smov %s3703_s29 }
 0x35f PF: > { %s3808_s30 = sand.u32 63, %s3844_s24   ;;  %s2470_s10 = sshll.u32 %s3633_s20, 9 }
 0x360   : > { %s2268_s11 = scalar_lea.vmem %s3428_s13, %s2470_s10 [#allocation2]   ;;  %s2270_s12 = scalar_lea.vmem %s3627_s18, %s2470_s10  }
 0x361   : > { %p2464_p13 = scmp.le.s32.totalorder %s3808_s30, 0 }
 0x362   : > { %s3003_s14 = smov (!%p2464_p13), %s2270_s12   ;;  %s3007_s15 = smov (!%p2464_p13), %s2268_s11  }
 0x363   : > { %2361 = sbr.rel (%p2464_p13) target bundleno = 884 (0x374), region = 143  ;;  %s3011_s17 = smov (!%p2464_p13), 0  }
 0x364   : > { %s3015_s19 = smov (!%p2464_p13), 0  }
 0x36a LB: >> { %v2280_v17 = vld [vmem:[%s3009_s15] sm:$0xff]  ;;  %s2282_s24 = sadd.s32 1, %s3013_s17  ;;  %s2274_s19 = sadd.s32 1, %s3017_s19   ;;  %s3017_s19 = sphi %s3015_s19, %s2274_s19   ;;  %s3013_s17 = sphi %s3011_s17, %s3012_s17   ;;  %s3009_s15 = sphi %s3007_s15, %s2287_s15   ;;  %s3005_s14 = sphi %s3003_s14, %s2288_s14  }
 0x36b   : >> { %2281 = vst [vmem:[%s3005_s14] sm:$0xff] %v2280_v17  ;;  %p2283_p0 = scmp.ge.s32.totalorder %s2282_s24, %s3808_s30  ;;  %p2273_p1 = scmp.ge.s32.totalorder %s2274_s19, %s3808_s30 }
 0x36d   : >> { %s3848_s24 = smov (%p2283_p0, %s2282_s24), 0  ;;  %2276 = sbr.rel (!%p2273_p1) target bundleno = 874 (0x36a), region = 149 }
 0x36e   : >> { %s2465_s13 = sshll.u32 %s3848_s24, 3  ;;  %s3012_s17 = smov %s3848_s24  }
 0x36f   : >> { %s2287_s15 = scalar_lea.vmem %s2268_s11, %s2465_s13 [#allocation2]   ;;  %s2288_s14 = scalar_lea.vmem %s2270_s12, %s2465_s13  }
 0x374 PF: > { %p14_p2 = scmp.ge.s32.totalorder %s3075_s28, 5   ;;  %s3840_s24 = smov %s2981_s25 }
 0x375   : > { %s3841_s25 = smov %s3083_s8  ;;  %s3842_s26 = smov %s3075_s28 }
 0x376   :  { %16 = sbr.rel (!%p14_p2) target bundleno = 2 (0x2), region = 160 }

</bundles_post_ra>
